<compile_context>
chip_gen: v6e
topology: v6e:2x2x1
jax: 0.10.0
libtpu: 0.0.40
codegen_flags: <defaults>
</compile_context>

<pallas_src>
import jax
import jax.numpy as jnp
from jax.experimental import pallas as pl
from jax.experimental.pallas import tpu as pltpu

BN_EPS = 1e-5
LANE = 128          # vreg lane width: class dim padded to this
NEG_BIG = -1e30     # f32 bias for padded logits so they vanish under softmax


def _round_up(x, m):
    return ((x + m - 1) // m) * m


def _mlp_kernel(x_ref, w1_ref, b1_ref, w2_ref, b2_ref, o_ref):
    """Fused Linear -> ReLU -> (folded BN) -> Linear -> Softmax, one batch tile."""
    x = x_ref[...]                                              # (TB, Dp) bf16

    # ---- Linear 1 + bias + ReLU (MXU, f32 accumulation) ----
    h = jnp.dot(x, w1_ref[...], preferred_element_type=jnp.float32)
    h = jnp.maximum(h + b1_ref[...], 0.0)                       # (TB, Hp) f32

    # BatchNorm1d (eval) folded into w2/b2 on host; Dropout is identity in eval.

    # ---- Linear 2 + folded bias (class dim padded to 128 lanes) ----
    logits = jnp.dot(h.astype(w2_ref.dtype), w2_ref[...],
                     preferred_element_type=jnp.float32)
    logits = logits + b2_ref[...]                               # (TB, 128) f32

    # ---- Softmax over (padded) class dim; padded cols carry -1e30 bias ----
    m = jnp.max(logits, axis=-1, keepdims=True)
    e = jnp.exp(logits - m)
    denom = jnp.sum(e, axis=-1, keepdims=True)
    o_ref[...] = (e / denom).astype(o_ref.dtype)                # bf16 store


def prepare_params(raw):
    """Host-side prep: fold eval-mode BN into Linear2, pad D_in->128-multiple,
    H->256-multiple (MXU columns), classes->128 lanes; cast matmul operands
    to bf16.  Biases stay f32 (the -1e30 pad bias must NOT be cast to bf16)."""
    w1, b1 = raw["w1"], raw["b1"]
    gamma, beta = raw["gamma"], raw["beta"]
    mean, var = raw["running_mean"], raw["running_var"]
    w2, b2 = raw["w2"], raw["b2"]
    D_in, H = w1.shape
    C = w2.shape[1]

    s = gamma * jax.lax.rsqrt(var + BN_EPS)                     # (1, H)
    w2_eff = w2 * s[0][:, None]                                 # (H, C)
    b2_eff = b2 + (beta - mean * s) @ w2                        # (1, C)

    Dp = _round_up(D_in, LANE)
    Hp = _round_up(H, 256)      # 128 suffices on v5e; 256 for v6e/v7x MXU
    Cp = _round_up(max(C, LANE), LANE)

    w1p = jnp.zeros((Dp, Hp), jnp.float32).at[:D_in, :H].set(w1)
    b1p = jnp.zeros((1, Hp), jnp.float32).at[:, :H].set(b1)
    w2p = jnp.zeros((Hp, Cp), jnp.float32).at[:H, :C].set(w2_eff)
    b2p = jnp.full((1, Cp), NEG_BIG, jnp.float32).at[:, :C].set(b2_eff)

    return {
        "w1": w1p.astype(jnp.bfloat16),
        "b1": b1p,                       # f32
        "w2p": w2p.astype(jnp.bfloat16),
        "b2p": b2p,                      # f32 (keeps -1e30 pad bias exact)
        "num_classes": C,
        "input_size": D_in,
    }


def _vmem_estimate(TB, Dp, Hp, Cp, weight_bufs):
    """Rough VMEM bound: double-buffered streams, weights, intermediates."""
    stream = 2 * TB * Dp * 2 + 2 * TB * Cp * 2            # bf16 x / bf16 out
    weights = weight_bufs * (Dp * Hp * 2 + Hp * 4 + Hp * Cp * 2 + Cp * 4)
    interm = TB * Hp * 6 + TB * Cp * 16                   # h f32+bf16, logits/exp
    return stream + weights + interm + (4 << 20)           # + margin


def simple_multiclass_forward(x, params, *, block_rows=1024,
                              out_dtype=jnp.bfloat16, trim=True):
    """x: (B, D_in) float32.  params: output of prepare_params.

    Returns (B, num_classes) probabilities in `out_dtype`.  For fully fused
    downstream consumption of the padded (Bp, 128) block, pass trim=False and
    slice at the consumer.
    """
    B, D_in = x.shape
    assert D_in == params["input_size"]
    w1, b1 = params["w1"], params["b1"]
    w2p, b2p = params["w2p"], params["b2p"]
    C = params["num_classes"]
    Dp, Hp = w1.shape
    Cp = w2p.shape[1]

    # Batch tiling: TB rows per grid step, multiple of 8 sublanes, and capped
    # at ceil(B/2) so the grid has >=2 steps (lets ("parallel",) shard across
    # the two TensorCores on v7x); batch padded up to a multiple of TB.
    half = _round_up(pl.cdiv(B, 2), 8)
    TB = max(8, min(_round_up(block_rows, 8), half))
    Bp = _round_up(B, TB)
    nb = Bp // TB

    xb = x.astype(jnp.bfloat16)
    if Bp != B or Dp != D_in:
        xb = jnp.pad(xb, ((0, Bp - B), (0, Dp - D_in)))

    cost = pl.CostEstimate(
        flops=2 * Bp * (Dp * Hp + Hp * Cp),
        transcendentals=Bp * Cp,
        bytes_accessed=(xb.size * 2 + w1.size * 2 + b1.size * 4
                        + w2p.size * 2 + b2p.size * 4 + Bp * Cp * 2),
    )

    def run(single_buffer_weights):
        if single_buffer_weights:
            # Constant index_map => keep a single resident copy of each weight.
            def resident(shape):
                return pl.BlockSpec(shape, lambda i: (0, 0),
                                    pipeline_mode=pl.Buffered(1))
            wbufs = 1
        else:
            def resident(shape):
                return pl.BlockSpec(shape, lambda i: (0, 0))
            wbufs = 2

        vmem_limit = min(max(_vmem_estimate(TB, Dp, Hp, Cp, wbufs), 16 << 20),
                         56 << 20)   # stay under v7x's 64 MiB physical VMEM

        return pl.pallas_call(
            _mlp_kernel,
            out_shape=jax.ShapeDtypeStruct((Bp, Cp), jnp.bfloat16),
            grid_spec=pltpu.PrefetchScalarGridSpec(
                num_scalar_prefetch=0,
                grid=(nb,),
                in_specs=[
                    pl.BlockSpec((TB, Dp), lambda i: (i, 0)),  # x: batch-tiled
                    resident((Dp, Hp)),                        # w1
                    resident((1, Hp)),                         # b1
                    resident((Hp, Cp)),                        # folded w2
                    resident((1, Cp)),                         # folded b2
                ],
                out_specs=pl.BlockSpec((TB, Cp), lambda i: (i, 0)),
            ),
            compiler_params=pltpu.CompilerParams(
                dimension_semantics=("parallel",),
                vmem_limit_bytes=vmem_limit,
            ),
            cost_estimate=cost,
        )(xb, w1, b1, w2p, b2p)

    try:
        out = run(single_buffer_weights=True)
    except Exception:
        # Fallback for JAX versions where Buffered(1) on pallas_call in_specs
        # isn't supported: default double-buffered resident weights.
        out = run(single_buffer_weights=False)

    if out.dtype != out_dtype:
        out = out.astype(out_dtype)
    if not trim:
        return out
    if Bp == B and Cp == C:
        return out
    if Bp == B:
        return out[:, :C]
    return out[:B, :C]


def init_params(key, input_size, hidden_size, num_classes):
    """Deterministic PyTorch-style init (uniform +-1/sqrt(fan_in)) + fresh BN."""
    k1, k2, k3, k4 = jax.random.split(key, 4)
    s1 = 1.0 / jnp.sqrt(input_size)
    s2 = 1.0 / jnp.sqrt(hidden_size)
    return {
        "w1": jax.random.uniform(k1, (input_size, hidden_size),
                                 jnp.float32, -s1, s1),
        "b1": jax.random.uniform(k2, (1, hidden_size), jnp.float32, -s1, s1),
        "gamma": jnp.ones((1, hidden_size), jnp.float32),
        "beta": jnp.zeros((1, hidden_size), jnp.float32),
        "running_mean": jnp.zeros((1, hidden_size), jnp.float32),
        "running_var": jnp.ones((1, hidden_size), jnp.float32),
        "w2": jax.random.uniform(k3, (hidden_size, num_classes),
                                 jnp.float32, -s2, s2),
        "b2": jax.random.uniform(k4, (1, num_classes), jnp.float32, -s2, s2),
    }


def reference_forward(x, p):
    """Pure-JAX f32 reference (unfolded BN) for correctness checking."""
    h = jnp.maximum(x @ p["w1"] + p["b1"], 0.0)
    h = (h - p["running_mean"]) / jnp.sqrt(p["running_var"] + BN_EPS)
    h = h * p["gamma"] + p["beta"]
    logits = h @ p["w2"] + p["b2"]
    return jax.nn.softmax(logits, axis=1)


if __name__ == "__main__":
    # Small shapes consistent with the module (scaled-down defaults).
    B, D_IN, HIDDEN, NUM_CLASSES = 16, 256, 512, 5

    key = jax.random.PRNGKey(0)
    kx, kp = jax.random.split(key)
    x = jax.random.normal(kx, (B, D_IN), jnp.float32)
    raw = init_params(kp, D_IN, HIDDEN, NUM_CLASSES)
    params = prepare_params(raw)

    # block_rows=8 exercises the multi-step batch grid at this toy size;
    # production sizes use the default 1024-row tiles (2048 is fine on v7x).
    out = simple_multiclass_forward(x, params, block_rows=8)
    out = jax.block_until_ready(out)

    ref = reference_forward(x, raw)
    out_f32 = out.astype(jnp.float32)
    assert out.shape == (B, NUM_CLASSES)
    # bf16 matmul operands + bf16 output -> relaxed tolerance vs f32 reference.
    assert jnp.allclose(out_f32, ref, atol=2e-2, rtol=0), "mismatch vs reference"
    assert jnp.allclose(jnp.sum(out_f32, axis=1), 1.0, atol=1e-2), \
        "softmax rows != 1"

    print("KERNEL_OK")
</pallas_src>

<mosaic_0001>
module attributes {stable_mosaic.version = 11 : i64} {
  func.func @_mlp_kernel(%arg0: i32, %arg1: memref<8x256xbf16, #tpu.memory_space<vmem>>, %arg2: memref<256x512xbf16, #tpu.memory_space<vmem>>, %arg3: memref<1x512xf32, #tpu.memory_space<vmem>>, %arg4: memref<512x128xbf16, #tpu.memory_space<vmem>>, %arg5: memref<1x128xf32, #tpu.memory_space<vmem>>, %arg6: memref<8x128xbf16, #tpu.memory_space<vmem>>) attributes {dimension_semantics = [#tpu.dimension_semantics<parallel>], iteration_bounds = array<i64: 2>, scalar_prefetch = 0 : i64, scratch_operands = 0 : i64, tpu.core_type = #tpu.core_type<tc>, window_params = [{transform_indices = @transform_0, window_bounds = array<i64: 8, 256>}, {pipeline_mode = #tpu.pipeline_mode<synchronous>, transform_indices = @transform_1, window_bounds = array<i64: 256, 512>}, {pipeline_mode = #tpu.pipeline_mode<synchronous>, transform_indices = @transform_2, window_bounds = array<i64: 1, 512>}, {pipeline_mode = #tpu.pipeline_mode<synchronous>, transform_indices = @transform_3, window_bounds = array<i64: 512, 128>}, {pipeline_mode = #tpu.pipeline_mode<synchronous>, transform_indices = @transform_4, window_bounds = array<i64: 1, 128>}, {transform_indices = @transform_5, window_bounds = array<i64: 8, 128>}]} {
    %c0 = arith.constant 0 : index
    %c0_0 = arith.constant 0 : index
    %0 = vector.load %arg1[%c0, %c0_0] : memref<8x256xbf16, #tpu.memory_space<vmem>>, vector<8x256xbf16>
    %c0_1 = arith.constant 0 : index
    %c0_2 = arith.constant 0 : index
    %1 = vector.load %arg2[%c0_1, %c0_2] : memref<256x512xbf16, #tpu.memory_space<vmem>>, vector<256x512xbf16>
    %cst = arith.constant dense<0.000000e+00> : vector<8x512xf32>
    %2 = tpu.matmul %0, %1, %cst {dimension_numbers = #tpu.dot_dimension_numbers<[1], [0], [0], [1], [0, 0, 1, 1], [], []>} : vector<8x256xbf16>, vector<256x512xbf16>, vector<8x512xf32> -> vector<8x512xf32>
    %c0_3 = arith.constant 0 : index
    %c0_4 = arith.constant 0 : index
    %3 = vector.load %arg3[%c0_3, %c0_4] : memref<1x512xf32, #tpu.memory_space<vmem>>, vector<1x512xf32>
    %4 = vector.broadcast %3 : vector<1x512xf32> to vector<8x512xf32>
    %5 = arith.addf %2, %4 : vector<8x512xf32>
    %cst_5 = arith.constant 0.000000e+00 : f32
    %6 = vector.broadcast %cst_5 : f32 to vector<8x512xf32>
    %7 = arith.maximumf %5, %6 : vector<8x512xf32>
    %8 = arith.truncf %7 : vector<8x512xf32> to vector<8x512xbf16>
    %c0_6 = arith.constant 0 : index
    %c0_7 = arith.constant 0 : index
    %9 = vector.load %arg4[%c0_6, %c0_7] : memref<512x128xbf16, #tpu.memory_space<vmem>>, vector<512x128xbf16>
    %cst_8 = arith.constant dense<0.000000e+00> : vector<8x128xf32>
    %10 = tpu.matmul %8, %9, %cst_8 {dimension_numbers = #tpu.dot_dimension_numbers<[1], [0], [0], [1], [0, 0, 1, 1], [], []>} : vector<8x512xbf16>, vector<512x128xbf16>, vector<8x128xf32> -> vector<8x128xf32>
    %c0_9 = arith.constant 0 : index
    %c0_10 = arith.constant 0 : index
    %11 = vector.load %arg5[%c0_9, %c0_10] : memref<1x128xf32, #tpu.memory_space<vmem>>, vector<1x128xf32>
    %12 = vector.broadcast %11 : vector<1x128xf32> to vector<8x128xf32>
    %13 = arith.addf %10, %12 : vector<8x128xf32>
    %cst_11 = arith.constant dense<0xFF800000> : vector<8xf32>
    %14 = vector.multi_reduction <maximumf>, %13, %cst_11 [1] : vector<8x128xf32> to vector<8xf32>
    %15 = vector.shape_cast %14 : vector<8xf32> to vector<8x1xf32>
    %16 = vector.broadcast %15 : vector<8x1xf32> to vector<8x128xf32>
    %17 = arith.subf %13, %16 : vector<8x128xf32>
    %18 = math.exp %17 : vector<8x128xf32>
    %cst_12 = arith.constant dense<0.000000e+00> : vector<8xf32>
    %19 = vector.multi_reduction <add>, %18, %cst_12 [1] : vector<8x128xf32> to vector<8xf32>
    %20 = vector.shape_cast %19 : vector<8xf32> to vector<8x1xf32>
    %21 = vector.broadcast %20 : vector<8x1xf32> to vector<8x128xf32>
    %22 = arith.divf %18, %21 : vector<8x128xf32>
    %23 = arith.truncf %22 : vector<8x128xf32> to vector<8x128xbf16>
    %c0_13 = arith.constant 0 : index
    %c0_14 = arith.constant 0 : index
    %24 = vector.load %arg6[%c0_13, %c0_14] : memref<8x128xbf16, #tpu.memory_space<vmem>>, vector<8x128xbf16>
    tpu.vector_store %arg6[%c0_13, %c0_14], %23 {strides = array<i32>} : memref<8x128xbf16, #tpu.memory_space<vmem>>, vector<8x128xbf16>,
    return
  }
  func.func @transform_0(%arg0: i32) -> (i32, i32) {
    %c0_i32 = arith.constant 0 : i32
    %c0_i32_0 = arith.constant 0 : i32
    return %arg0, %c0_i32 : i32, i32
  }
  func.func @transform_1(%arg0: i32) -> (i32, i32) {
    %c0_i32 = arith.constant 0 : i32
    %c0_i32_0 = arith.constant 0 : i32
    %c0_i32_1 = arith.constant 0 : i32
    return %c0_i32, %c0_i32_0 : i32, i32
  }
  func.func @transform_2(%arg0: i32) -> (i32, i32) {
    %c0_i32 = arith.constant 0 : i32
    %c0_i32_0 = arith.constant 0 : i32
    %c0_i32_1 = arith.constant 0 : i32
    return %c0_i32, %c0_i32_0 : i32, i32
  }
  func.func @transform_3(%arg0: i32) -> (i32, i32) {
    %c0_i32 = arith.constant 0 : i32
    %c0_i32_0 = arith.constant 0 : i32
    %c0_i32_1 = arith.constant 0 : i32
    return %c0_i32, %c0_i32_0 : i32, i32
  }
  func.func @transform_4(%arg0: i32) -> (i32, i32) {
    %c0_i32 = arith.constant 0 : i32
    %c0_i32_0 = arith.constant 0 : i32
    %c0_i32_1 = arith.constant 0 : i32
    return %c0_i32, %c0_i32_0 : i32, i32
  }
  func.func @transform_5(%arg0: i32) -> (i32, i32) {
    %c0_i32 = arith.constant 0 : i32
    %c0_i32_0 = arith.constant 0 : i32
    return %arg0, %c0_i32 : i32, i32
  }
}

module attributes {stable_mosaic.version = 11 : i64} {
  func.func @_mlp_kernel(%arg0: i32, %arg1: memref<8x256xbf16, #tpu.memory_space<vmem>>, %arg2: memref<256x512xbf16, #tpu.memory_space<vmem>>, %arg3: memref<1x512xf32, #tpu.memory_space<vmem>>, %arg4: memref<512x128xbf16, #tpu.memory_space<vmem>>, %arg5: memref<1x128xf32, #tpu.memory_space<vmem>>, %arg6: memref<8x128xbf16, #tpu.memory_space<vmem>>) attributes {dimension_semantics = [#tpu.dimension_semantics<parallel>], iteration_bounds = array<i64: 2>, scalar_prefetch = 0 : i64, scratch_operands = 0 : i64, tpu.core_type = #tpu.core_type<tc>, window_params = [{transform_indices = @transform_0, window_bounds = array<i64: 8, 256>}, {pipeline_mode = #tpu.pipeline_mode<synchronous>, transform_indices = @transform_1, window_bounds = array<i64: 256, 512>}, {pipeline_mode = #tpu.pipeline_mode<synchronous>, transform_indices = @transform_2, window_bounds = array<i64: 1, 512>}, {pipeline_mode = #tpu.pipeline_mode<synchronous>, transform_indices = @transform_3, window_bounds = array<i64: 512, 128>}, {pipeline_mode = #tpu.pipeline_mode<synchronous>, transform_indices = @transform_4, window_bounds = array<i64: 1, 128>}, {transform_indices = @transform_5, window_bounds = array<i64: 8, 128>}]} {
    %c0 = arith.constant 0 : index
    %c0_0 = arith.constant 0 : index
    %0 = vector.load %arg1[%c0, %c0_0] : memref<8x256xbf16, #tpu.memory_space<vmem>>, vector<8x256xbf16>
    %c0_1 = arith.constant 0 : index
    %c0_2 = arith.constant 0 : index
    %1 = vector.load %arg2[%c0_1, %c0_2] : memref<256x512xbf16, #tpu.memory_space<vmem>>, vector<256x512xbf16>
    %cst = arith.constant dense<0.000000e+00> : vector<8x512xf32>
    %2 = tpu.matmul %0, %1, %cst {dimension_numbers = #tpu.dot_dimension_numbers<[1], [0], [0], [1], [0, 0, 1, 1], [], []>} : vector<8x256xbf16>, vector<256x512xbf16>, vector<8x512xf32> -> vector<8x512xf32>
    %c0_3 = arith.constant 0 : index
    %c0_4 = arith.constant 0 : index
    %3 = vector.load %arg3[%c0_3, %c0_4] : memref<1x512xf32, #tpu.memory_space<vmem>>, vector<1x512xf32>
    %4 = vector.broadcast %3 : vector<1x512xf32> to vector<8x512xf32>
    %5 = arith.addf %2, %4 : vector<8x512xf32>
    %cst_5 = arith.constant 0.000000e+00 : f32
    %6 = vector.broadcast %cst_5 : f32 to vector<8x512xf32>
    %7 = arith.maximumf %5, %6 : vector<8x512xf32>
    %8 = arith.truncf %7 : vector<8x512xf32> to vector<8x512xbf16>
    %c0_6 = arith.constant 0 : index
    %c0_7 = arith.constant 0 : index
    %9 = vector.load %arg4[%c0_6, %c0_7] : memref<512x128xbf16, #tpu.memory_space<vmem>>, vector<512x128xbf16>
    %cst_8 = arith.constant dense<0.000000e+00> : vector<8x128xf32>
    %10 = tpu.matmul %8, %9, %cst_8 {dimension_numbers = #tpu.dot_dimension_numbers<[1], [0], [0], [1], [0, 0, 1, 1], [], []>} : vector<8x512xbf16>, vector<512x128xbf16>, vector<8x128xf32> -> vector<8x128xf32>
    %c0_9 = arith.constant 0 : index
    %c0_10 = arith.constant 0 : index
    %11 = vector.load %arg5[%c0_9, %c0_10] : memref<1x128xf32, #tpu.memory_space<vmem>>, vector<1x128xf32>
    %12 = vector.broadcast %11 : vector<1x128xf32> to vector<8x128xf32>
    %13 = arith.addf %10, %12 : vector<8x128xf32>
    %cst_11 = arith.constant dense<0xFF800000> : vector<8xf32>
    %14 = vector.multi_reduction <maximumf>, %13, %cst_11 [1] : vector<8x128xf32> to vector<8xf32>
    %15 = vector.shape_cast %14 : vector<8xf32> to vector<8x1xf32>
    %16 = vector.broadcast %15 : vector<8x1xf32> to vector<8x128xf32>
    %17 = arith.subf %13, %16 : vector<8x128xf32>
    %18 = math.exp %17 : vector<8x128xf32>
    %cst_12 = arith.constant dense<0.000000e+00> : vector<8xf32>
    %19 = vector.multi_reduction <add>, %18, %cst_12 [1] : vector<8x128xf32> to vector<8xf32>
    %20 = vector.shape_cast %19 : vector<8xf32> to vector<8x1xf32>
    %21 = vector.broadcast %20 : vector<8x1xf32> to vector<8x128xf32>
    %22 = arith.divf %18, %21 : vector<8x128xf32>
    %23 = arith.truncf %22 : vector<8x128xf32> to vector<8x128xbf16>
    %c0_13 = arith.constant 0 : index
    %c0_14 = arith.constant 0 : index
    %24 = vector.load %arg6[%c0_13, %c0_14] : memref<8x128xbf16, #tpu.memory_space<vmem>>, vector<8x128xbf16>
    tpu.vector_store %arg6[%c0_13, %c0_14], %23 {strides = array<i32>} : memref<8x128xbf16, #tpu.memory_space<vmem>>, vector<8x128xbf16>,
    return
  }
  func.func @transform_0(%arg0: i32) -> (i32, i32) {
    %c0_i32 = arith.constant 0 : i32
    %c0_i32_0 = arith.constant 0 : i32
    return %arg0, %c0_i32 : i32, i32
  }
  func.func @transform_1(%arg0: i32) -> (i32, i32) {
    %c0_i32 = arith.constant 0 : i32
    %c0_i32_0 = arith.constant 0 : i32
    %c0_i32_1 = arith.constant 0 : i32
    return %c0_i32, %c0_i32_0 : i32, i32
  }
  func.func @transform_2(%arg0: i32) -> (i32, i32) {
    %c0_i32 = arith.constant 0 : i32
    %c0_i32_0 = arith.constant 0 : i32
    %c0_i32_1 = arith.constant 0 : i32
    return %c0_i32, %c0_i32_0 : i32, i32
  }
  func.func @transform_3(%arg0: i32) -> (i32, i32) {
    %c0_i32 = arith.constant 0 : i32
    %c0_i32_0 = arith.constant 0 : i32
    %c0_i32_1 = arith.constant 0 : i32
    return %c0_i32, %c0_i32_0 : i32, i32
  }
  func.func @transform_4(%arg0: i32) -> (i32, i32) {
    %c0_i32 = arith.constant 0 : i32
    %c0_i32_0 = arith.constant 0 : i32
    %c0_i32_1 = arith.constant 0 : i32
    return %c0_i32, %c0_i32_0 : i32, i32
  }
  func.func @transform_5(%arg0: i32) -> (i32, i32) {
    %c0_i32 = arith.constant 0 : i32
    %c0_i32_0 = arith.constant 0 : i32
    return %arg0, %c0_i32 : i32, i32
  }
}

</mosaic_0001>

<bundles_post_ra>
// kernel: tpu_custom_call.1
= control target key start
LH: loop header
LB: loop body
LE: loop exit
PB: predicated region body
PF: predicated region fallthrough
CT: control target
= control target key end

     0   :  { %10 = vsyncpa [#allocation3], 0  ;;  %s2036_s0 = inlined_call_operand.hbm [shape: bf16[16,256], index: 0, kind: input, shape index: {}]   ;;  %s2037_s1 = inlined_call_operand.hbm [shape: bf16[256,512], index: 1, kind: input, shape index: {}]   ;;  %s2038_s2 = inlined_call_operand.hbm [shape: f32[1,512], index: 2, kind: input, shape index: {}]   ;;  %s2039_s3 = inlined_call_operand.hbm [shape: bf16[512,128], index: 3, kind: input, shape index: {}]   ;;  %s2040_s4 = inlined_call_operand.vmem [shape: f32[1,128], index: 4, kind: input, shape index: {}]   ;;  %s2041_s5 = inlined_call_operand.hbm [shape: bf16[16,128], index: 5, kind: output, shape index: {}]  }
   0x1   :  { %12 = vsyncpa [#allocation3 + $0x1], 0 }
   0x2   :  { %13 = vsyncpa [#allocation6], 0 }
   0x3   :  { %14 = vsyncpa [#allocation9], 0 }
   0x4   :  { %15 = vsyncpa [#allocation4], 0 }
   0x5   :  { %17 = vsyncpa [#allocation4 + $0x1], 0  ;;  %s1852_s18 = smov 0   ;;  %s1854_s19 = smov 0  }
   0x6   :  { %s1856_s20 = smov 0   ;;  %s1858_s21 = smov 0  }
   0x7 LB: > { %s1873_s22 = sadd.s32 4294967295, %s1811_s21   ;;  %s1255_s23 = sadd.s32 4294967294, %s1811_s21   ;;  %s1811_s21 = sphi %s1858_s21, %s2065_s21   ;;  %s1807_s20 = sphi %s1856_s20, %s2064_s20   ;;  %s1803_s19 = sphi %s1854_s19, %s2063_s19   ;;  %s1799_s18 = sphi %s1852_s18, %s2062_s18  }
   0x8   : > { %p43_p0 = scmp.ne.s32.totalorder %s1803_s19, %s1799_s18  ;;  %p2042_p1 = scmp.eq.s32.totalorder %s1873_s22, 0 }
   0x9   : > { %p157_p3 = scmp.eq.s32.totalorder %s1255_s23, 1  ;;  %p1256_p5 = scmp.ge.s32.totalorder %s1811_s21, 1 }
   0xa   : > { %p1882_p4 = por %p2042_p1, %p43_p0  ;;  %p164_p7 = scmp.lt.s32.totalorder %s1811_s21, 3 }
   0xb   : > { %p1887_p6 = por %p157_p3, %p43_p0  ;;  %s1813_s27 = smov [#allocation5]  }
   0xc   : > { %s2046_s24 = scalar_select %p1882_p4, 1, 0 }
   0xd   : > { %s2047_s25 = scalar_select %p1887_p6, 1, 0 }
   0xe   : > { %p1892_p8 = pnand %p1256_p5, %p164_p7  ;;  %s176_s28 = sshll.u32 %s1813_s27, 4  ;;  %s177_s28 = int_to_ptr.vmem [resolvable:$true] %s176_s28 }
   0xf   : > { %s1814_s30 = smov [#allocation7]   ;;  %s1815_s7 = smov [#allocation8]  }
  0x10   : > { %s2048_s26 = scalar_select %p1892_p8, 1, 0 }
  0x11   : > { %p1434_p9 = pneg %p1892_p8  ;;  %s190_s6 = sshll.u32 %s1814_s30, 4  ;;  %s191_s6 = int_to_ptr.vmem [resolvable:$true] %s190_s6 }
  0x12   : > { %s200_s8 = sshll.u32 %s1815_s7, 4  ;;  %s1644_s9 = scalar_lea.vmem %s177_s28, 8192  ;;  %s201_s8 = int_to_ptr.vmem [resolvable:$true] %s200_s8 }
  0x13   : > { %p1901_p11 = pnand %p1434_p9, %p2042_p1  ;;  %p1645_p13 = scmp.ne.s32.totalorder %s177_s28, %s1644_s9 }
  0x14   : > { %p1652_p5 = scmp.lt.s32.totalorder %s177_s28, %s177_s28  ;;  %p1653_p7 = scmp.lt.s32.totalorder %s1644_s9, %s1644_s9 }
  0x15   : > { %p1635_p12 = pneg %p1901_p11 }
  0x16   : > { %p1654_p9 = por %p1653_p7, %p1652_p5 }
  0x17   : > { %p1647_p0 = pnand %p1645_p13, %p1635_p12 }
  0x19   : > { %p1648_p3 = pneg %p1647_p0 }
  0x1b   : > { %p1655_p10 = pnand %p1654_p9, %p1648_p3 }
  0x1d   : > { %1658 = shalt.err (!%p1655_p10)
}
  0x1e   : > { %s1816_s10 = smov 256   ;;  %s1817_s11 = smov 16  }
  0x1f   : > { %1437 = dma.hbm_to_vmem [thread:$0]  (!%p1901_p11), %s2037_s1, 8192, %s177_s28, [#allocation6], %s1816_s10, %s1816_s10, %s1817_s11  }
  0x20   : > { %s1670_s14 = scalar_lea.vmem %s191_s6, 64  ;;  %p1678_p2 = scmp.lt.s32.totalorder %s191_s6, %s191_s6 }
  0x21   : > { %p1671_p1 = scmp.ne.s32.totalorder %s191_s6, %s1670_s14  ;;  %p1679_p6 = scmp.lt.s32.totalorder %s1670_s14, %s1670_s14 }
  0x23   : > { %p1673_p13 = pnand %p1671_p1, %p1635_p12  ;;  %p1680_p5 = por %p1679_p6, %p1678_p2 }
  0x25   : > { %p1674_p0 = pneg %p1673_p13 }
  0x27   : > { %p1681_p3 = pnand %p1680_p5, %p1674_p0 }
  0x29   : > { %1684 = shalt.err (!%p1681_p3)
}
  0x2a   : > { %1440 = dma.hbm_to_vmem [thread:$0]  (!%p1901_p11), %s2038_s2, 64, %s191_s6, [#allocation6]  }
  0x2b   : > { %s1696_s17 = scalar_lea.vmem %s201_s8, 4096  ;;  %p1704_p9 = scmp.lt.s32.totalorder %s201_s8, %s201_s8 }
  0x2c   : > { %p1697_p10 = scmp.ne.s32.totalorder %s201_s8, %s1696_s17  ;;  %p1705_p13 = scmp.lt.s32.totalorder %s1696_s17, %s1696_s17 }
  0x2e   : > { %p1699_p7 = pnand %p1697_p10, %p1635_p12  ;;  %p1706_p4 = por %p1705_p13, %p1704_p9 }
  0x30   : > { %p1700_p1 = pneg %p1699_p7 }
  0x32   : > { %p1707_p2 = pnand %p1706_p4, %p1700_p1 }
  0x34   : > { %1710 = shalt.err (!%p1707_p2)
}
  0x35   : > { %s1818_s23 = smov 64   ;;  %s1819_s27 = smov 4  }
  0x36   : > { %1443 = dma.hbm_to_vmem [thread:$0]  (!%p1901_p11), %s2039_s3, 4096, %s201_s8, [#allocation9], %s1818_s23, %s1818_s23, %s1819_s27  }
  0x37   : > { %s1932_s6 = sadd.s32 1, %s1811_s21   ;;  %s30_s9 = sadd.s32 1, %s1807_s20 }
  0x38   : > { %s27_s7 = ssub.s32 %s1811_s21, %s1932_s6  ;;  %p37_p6 = scmp.ne.s32.totalorder %s1807_s20, %s1803_s19 }
  0x39   : > { %p28_p4 = scmp.eq.s32.totalorder %s27_s7, 0  ;;  %p38_p12 = scmp.eq.s32.totalorder %s1811_s21, 0 }
  0x3a   : > { %p1455_p0 = scmp.lt.s32.totalorder %s1811_s21, 2  ;;  %p2050_p3 = scmp.eq.s32.totalorder %s1873_s22, 1 }
  0x3b   : > { %s1942_s10 = scalar_select %p28_p4, %s1807_s20, %s30_s9  }
  0x3c   : > { %p39_p5 = por %p38_p12, %p37_p6  ;;  %p1946_p10 = por %p2050_p3, %p37_p6 }
  0x3d   : > { %s217_s29 = sand.u32 1, %s1807_s20   ;;  %s1373_s12 = sshll.u32 %s1811_s21, 7 }
  0x3e   : > { %s2051_s11 = scalar_select %p1946_p10, 1, 0 }
  0x3f   : > { %s1261_s8 = sshll.u32 %s217_s29, 3  ;;  %s1955_s15 = scalar_lea.hbm %s2036_s0, %s1373_s12 }
  0x40   : > { %s221_s16 = scalar_lea.vmem [#allocation2], %s1261_s8  ;;  %p1957_p11 = pnand %p1455_p0, %p39_p5 }
  0x41   : > { %s229_s17 = sshll.u32 %s221_s16, 4  ;;  %s218_s27 = scalar_lea.sflag [#allocation3], %s217_s29  ;;  %s230_s17 = int_to_ptr.vmem [resolvable:$true] %s229_s17 }
  0x42   : > { %s1711_s28 = scalar_lea.hbm %s1955_s15, 128  ;;  %p1713_p1 = pneg %p1957_p11 }
  0x43   : > { %p1712_p7 = scmp.ne.s32.totalorder %s1955_s15, %s1711_s28  ;;  %s1716_s9 = scalar_lea.hbm %s2036_s0, 256 }
  0x44   : > { %p1717_p2 = scmp.lt.s32.totalorder %s1955_s15, %s2036_s0  ;;  %p1718_p4 = scmp.lt.s32.totalorder %s1716_s9, %s1711_s28 }
  0x45   : > { %p1714_p9 = pnand %p1713_p1, %p1712_p7 }
  0x46   : > { %p1719_p6 = por %p1718_p4, %p1717_p2 }
  0x47   : > { %p1715_p13 = pneg %p1714_p9 }
  0x49   : > { %p1720_p12 = pnand %p1719_p6, %p1715_p13 }
  0x4b   : > { %1723 = shalt.err (!%p1720_p12)
}
  0x4c   : > { %s1724_s13 = scalar_lea.vmem %s230_s17, 128  ;;  %s1820_s29 = smov [#allocation2]  }
  0x4d   : > { %p1725_p0 = scmp.ne.s32.totalorder %s230_s17, %s1724_s13  ;;  %s1729_s14 = sshll.u32 %s1820_s29, 4  ;;  %s1730_s14 = int_to_ptr.vmem [resolvable:$false] %s1729_s14 }
  0x4e   : > { %s1731_s16 = scalar_lea.vmem %s1730_s14, 256  ;;  %p1732_p7 = scmp.lt.s32.totalorder %s230_s17, %s1730_s14 }
  0x4f   : > { %p1727_p5 = pnand %p1725_p0, %p1713_p1  ;;  %p1733_p9 = scmp.lt.s32.totalorder %s1731_s16, %s1724_s13 }
  0x51   : > { %p1728_p3 = pneg %p1727_p5  ;;  %p1734_p10 = por %p1733_p9, %p1732_p7 }
  0x53   : > { %p1735_p8 = pnand %p1734_p10, %p1728_p3 }
  0x55   : > { %1738 = shalt.err (!%p1735_p8)
}
  0x56   : > { %1447 = dma.hbm_to_vmem [thread:$0]  (!%p1957_p11), %s1955_s15, 128, %s230_s17, %s218_s27  }
  0x57   : > { %p2053_p13 = scmp.ne.s32.totalorder %s2048_s26, 0 }
  0x58   : > { %s1978_s28 = sand.u32 (!%p2053_p13), 1, %s1803_s19   ;;  %p2054_p1 = scmp.ne.s32.totalorder (!%p2053_p13), %s2046_s24, 0 }
  0x59   : > { %238 = sbr.rel (%p2053_p13) target bundleno = 894 (0x37e), region = 40  ;;  %s1265_s30 = sshll.u32 (!%p2053_p13), %s1978_s28, 3 }
  0x5a   : > { %s241_s7 = scalar_lea.sflag (!%p2053_p13), [#allocation3], %s1978_s28  ;;  %s1982_s9 = scalar_lea.vmem (!%p2053_p13), [#allocation2], %s1265_s30 }
  0x5e   : > { %1782 = dma.done.wait (%p2054_p1), %s241_s7, 128  }
  0x5f   : > { %1784 = vsyncadd (%p2054_p1), %s241_s7, 4294967168  ;;  %p2055_p8 = scmp.eq.s32.totalorder %s1873_s22, 0 }
  0x61   : > { %1786 = dma.done.wait (%p2055_p8), [#allocation6], 8256   ;;  %p2056_p10 = pmov %p2055_p8 }
  0x62   : > { %p2057_p11 = pmov %p2055_p8 }
  0x63   : > { %1788 = vsyncadd (%p2056_p10), [#allocation6], 4294959040 }
  0x64   : > { %1790 = dma.done.wait (%p2057_p11), [#allocation9], 4096   ;;  %p2058_p2 = pmov %p2055_p8 }
  0x65   : > { %v1499_v0 = vld [vmem:[#allocation5 + $0xe4] ss:$16 sps:$4 sm:$0xff]   ;;  %v1501_v1 = vld [vmem:[#allocation5 + $0xec] ss:$16 sps:$4 sm:$0xff]   ;;  %v1503_v2 = vld [vmem:[#allocation5 + $0xe0] ss:$16 sps:$4 sm:$0xff]  }
  0x66   : > { %1792 = vsyncadd (%p2058_p2), [#allocation9], 4294963200  ;;  %698 = vmatprep.subr.bf16.mxu0 %v1499_v0  ;;  %v1504_v3 = vld [vmem:[#allocation5 + $0xe8] ss:$16 sps:$4 sm:$0xff]   ;;  %739 = vmatprep.subr.bf16.mxu1 %v1501_v1  ;;  %v1505_v4 = vld [vmem:[#allocation5 + $0xc4] ss:$16 sps:$4 sm:$0xff]  }
  0x67   : > { %699 = vmatpush1.bf16.msra.mxu0 %v1503_v2  ;;  %740 = vmatpush1.bf16.msra.mxu1 %v1504_v3  ;;  %v1507_v5 = vld [vmem:[#allocation5 + $0xcc] ss:$16 sps:$4 sm:$0xff]   ;;  %v1509_v6 = vld [vmem:[#allocation5 + $0xc0] ss:$16 sps:$4 sm:$0xff]   ;;  %v1510_v7 = vld [vmem:[#allocation5 + $0xc8] ss:$16 sps:$4 sm:$0xff]  }
  0x68   : > { %700 = vmatprep.subr.bf16.mxu0 %v1505_v4  ;;  %741 = vmatprep.subr.bf16.mxu1 %v1507_v5  ;;  %v1511_v8 = vld [vmem:[#allocation5 + $0xa4] ss:$16 sps:$4 sm:$0xff]   ;;  %v1513_v9 = vld [vmem:[#allocation5 + $0xac] ss:$16 sps:$4 sm:$0xff]   ;;  %v1515_v10 = vld [vmem:[#allocation5 + $0xa0] ss:$16 sps:$4 sm:$0xff]  }
  0x69   : > { %v1516_v11 = vld [vmem:[#allocation5 + $0xa8] ss:$16 sps:$4 sm:$0xff]   ;;  %v1517_v12 = vld [vmem:[#allocation5 + $0x84] ss:$16 sps:$4 sm:$0xff]   ;;  %v1519_v13 = vld [vmem:[#allocation5 + $0x8c] ss:$16 sps:$4 sm:$0xff]  }
  0x6a   : > { %v1521_v14 = vld [vmem:[#allocation5 + $0x80] ss:$16 sps:$4 sm:$0xff]   ;;  %v1522_v15 = vld [vmem:[#allocation5 + $0x88] ss:$16 sps:$4 sm:$0xff]   ;;  %v1523_v16 = vld [vmem:[#allocation5 + $0x64] ss:$16 sps:$4 sm:$0xff]  }
  0x6b   : > { %701 = vmatpush1.bf16.msra.mxu0 %v1509_v6  ;;  %742 = vmatpush1.bf16.msra.mxu1 %v1510_v7  ;;  %v1525_v17 = vld [vmem:[#allocation5 + $0x6c] ss:$16 sps:$4 sm:$0xff]   ;;  %v1527_v18 = vld [vmem:[#allocation5 + $0x60] ss:$16 sps:$4 sm:$0xff]   ;;  %v1528_v19 = vld [vmem:[#allocation5 + $0x68] ss:$16 sps:$4 sm:$0xff]  }
  0x6c   : > { %702 = vmatprep.subr.bf16.mxu0 %v1511_v8  ;;  %743 = vmatprep.subr.bf16.mxu1 %v1513_v9  ;;  %v1529_v20 = vld [vmem:[#allocation5 + $0x44] ss:$16 sps:$4 sm:$0xff]   ;;  %v1531_v21 = vld [vmem:[#allocation5 + $0x4c] ss:$16 sps:$4 sm:$0xff]   ;;  %v1533_v22 = vld [vmem:[#allocation5 + $0x40] ss:$16 sps:$4 sm:$0xff]  }
  0x6d   : > { %v1534_v23 = vld [vmem:[#allocation5 + $0x48] ss:$16 sps:$4 sm:$0xff]   ;;  %v1535_v24 = vld [vmem:[#allocation5 + $0x24] ss:$16 sps:$4 sm:$0xff]   ;;  %v1537_v25 = vld [vmem:[#allocation5 + $0x2c] ss:$16 sps:$4 sm:$0xff]  }
  0x6e   : > { %v1539_v26 = vld [vmem:[#allocation5 + $0x20] ss:$16 sps:$4 sm:$0xff]   ;;  %v1540_v27 = vld [vmem:[#allocation5 + $0x28] ss:$16 sps:$4 sm:$0xff]   ;;  %v1541_v28 = vld [vmem:[#allocation5 + $0x4] ss:$16 sps:$4 sm:$0xff]  }
  0x6f   : > { %703 = vmatpush1.bf16.msra.mxu0 %v1515_v10  ;;  %744 = vmatpush1.bf16.msra.mxu1 %v1516_v11  ;;  %v1543_v29 = vld [vmem:[#allocation5 + $0xc] ss:$16 sps:$4 sm:$0xff]   ;;  %v1545_v30 = vld [vmem:[#allocation5] ss:$16 sps:$4 sm:$0xff]   ;;  %v1546_v31 = vld [vmem:[#allocation5 + $0x8] ss:$16 sps:$4 sm:$0xff]  }
  0x70   : > { %704 = vmatprep.subr.bf16.mxu0 %v1517_v12  ;;  %745 = vmatprep.subr.bf16.mxu1 %v1519_v13  ;;  %v1547_v32 = vld [vmem:[#allocation5 + $0x1e4] ss:$16 sps:$4 sm:$0xff]   ;;  %v1549_v33 = vld [vmem:[#allocation5 + $0x1ec] ss:$16 sps:$4 sm:$0xff]   ;;  %v1551_v34 = vld [vmem:[#allocation5 + $0x1e0] ss:$16 sps:$4 sm:$0xff]  }
  0x71   : > { %v1552_v35 = vld [vmem:[#allocation5 + $0x1e8] ss:$16 sps:$4 sm:$0xff]   ;;  %v1553_v36 = vld [vmem:[#allocation5 + $0x1c4] ss:$16 sps:$4 sm:$0xff]   ;;  %v1555_v37 = vld [vmem:[#allocation5 + $0x1cc] ss:$16 sps:$4 sm:$0xff]  }
  0x72   : > { %v1557_v38 = vld [vmem:[#allocation5 + $0x1c0] ss:$16 sps:$4 sm:$0xff]   ;;  %v1558_v39 = vld [vmem:[#allocation5 + $0x1c8] ss:$16 sps:$4 sm:$0xff]   ;;  %v1559_v40 = vld [vmem:[#allocation5 + $0x1a4] ss:$16 sps:$4 sm:$0xff]  }
  0x73   : > { %705 = vmatpush1.bf16.msra.mxu0 %v1521_v14  ;;  %746 = vmatpush1.bf16.msra.mxu1 %v1522_v15  ;;  %v1561_v41 = vld [vmem:[#allocation5 + $0x1ac] ss:$16 sps:$4 sm:$0xff]   ;;  %v1563_v42 = vld [vmem:[#allocation5 + $0x1a0] ss:$16 sps:$4 sm:$0xff]   ;;  %v1564_v43 = vld [vmem:[#allocation5 + $0x1a8] ss:$16 sps:$4 sm:$0xff]  }
  0x74   : > { %706 = vmatprep.subr.bf16.mxu0 %v1523_v16  ;;  %747 = vmatprep.subr.bf16.mxu1 %v1525_v17  ;;  %v1565_v44 = vld [vmem:[#allocation5 + $0x184] ss:$16 sps:$4 sm:$0xff]   ;;  %v1567_v45 = vld [vmem:[#allocation5 + $0x18c] ss:$16 sps:$4 sm:$0xff]   ;;  %v1569_v46 = vld [vmem:[#allocation5 + $0x180] ss:$16 sps:$4 sm:$0xff]  }
  0x75   : > { %v284_v47 = vld [vmem:[%s1982_s9] sm:$0xff]  ;;  %v1609_v15 = vld [vmem:[#allocation8 + $0x60] sm:$0xff]   ;;  %s1269_s15 = sshll.u32 %s1978_s28, 2  ;;  %s1370_s17 = sshll.u32 %s1873_s22, 6 }
  0x76   : > { %v1570_v48 = vld [vmem:[#allocation5 + $0x188] ss:$16 sps:$4 sm:$0xff]   ;;  %v1271_v49 = vcombine.high %v284_v47, %v284_v47  ;;  %v1571_v50 = vld [vmem:[#allocation5 + $0x164] ss:$16 sps:$4 sm:$0xff]   ;;  %v1573_v51 = vld [vmem:[#allocation5 + $0x16c] ss:$16 sps:$4 sm:$0xff]   ;;  %v1270_v5 = vcombine.low %v284_v47, %v284_v47  ;;  %s1154_s13 = scalar_lea.hbm %s2041_s5, %s1370_s17 }
  0x77   : > { %707 = vmatpush1.bf16.msra.mxu0 %v1527_v18  ;;  %748 = vmatpush1.bf16.msra.mxu1 %v1528_v19  ;;  %v1575_v52 = vld [vmem:[#allocation5 + $0x160] ss:$16 sps:$4 sm:$0xff]   ;;  %v1576_v53 = vld [vmem:[#allocation5 + $0x168] ss:$16 sps:$4 sm:$0xff]   ;;  %v1577_v54 = vld [vmem:[#allocation5 + $0x144] ss:$16 sps:$4 sm:$0xff]  }
  0x78   : > { %708 = vmatprep.subr.bf16.mxu0 %v1529_v20  ;;  %749 = vmatprep.subr.bf16.mxu1 %v1531_v21  ;;  %v1579_v55 = vld [vmem:[#allocation5 + $0x14c] ss:$16 sps:$4 sm:$0xff]   ;;  %v1581_v56 = vld [vmem:[#allocation5 + $0x140] ss:$16 sps:$4 sm:$0xff]   ;;  %v1582_v57 = vld [vmem:[#allocation5 + $0x148] ss:$16 sps:$4 sm:$0xff]  }
  0x79   : > { %730 = vmatprep.mubr.bf16.mxu0 %v1271_v49  ;;  %771 = vmatprep.mubr.bf16.mxu1 %v1271_v49  ;;  %v1583_v58 = vld [vmem:[#allocation5 + $0x124] ss:$16 sps:$4 sm:$0xff]   ;;  %v1585_v59 = vld [vmem:[#allocation5 + $0x12c] ss:$16 sps:$4 sm:$0xff]   ;;  %v1587_v60 = vld [vmem:[#allocation5 + $0x120] ss:$16 sps:$4 sm:$0xff]  }
  0x7a   : > { %v1588_v61 = vld [vmem:[#allocation5 + $0x128] ss:$16 sps:$4 sm:$0xff]   ;;  %v1589_v62 = vld [vmem:[#allocation5 + $0x104] ss:$16 sps:$4 sm:$0xff]   ;;  %v1591_v63 = vld [vmem:[#allocation5 + $0x10c] ss:$16 sps:$4 sm:$0xff]  }
  0x7b   : > { %709 = vmatpush1.bf16.msra.mxu0 %v1533_v22  ;;  %750 = vmatpush1.bf16.msra.mxu1 %v1534_v23  ;;  %v1593_v0 = vld [vmem:[#allocation5 + $0x100] ss:$16 sps:$4 sm:$0xff]   ;;  %v1594_v1 = vld [vmem:[#allocation5 + $0x108] ss:$16 sps:$4 sm:$0xff]   ;;  %s282_s23 = scalar_lea.vmem [#allocation10], %s1269_s15  ;;  %s1143_s29 = scalar_lea.sflag [#allocation4], %s1978_s28 }
  0x7c   : > { %710 = vmatprep.subr.bf16.mxu0 %v1535_v24  ;;  %751 = vmatprep.subr.bf16.mxu1 %v1537_v25  ;;  %v1597_v2 = vld [vmem:[#allocation8 + $0x78] sm:$0xff]   ;;  %v1601_v7 = vld [vmem:[#allocation8 + $0x70] sm:$0xff]   ;;  %v1605_v11 = vld [vmem:[#allocation8 + $0x68] sm:$0xff]   ;;  %s1156_s27 = sshll.u32 %s282_s23, 4  ;;  %p2059_p6 = scmp.ne.s32.totalorder %s2051_s11, 0  ;;  %s1157_s27 = int_to_ptr.vmem [resolvable:$true] %s1156_s27 }
  0x7d   : > { %v1598_v3 = vld [vmem:[#allocation8 + $0xf8] sm:$0xff]   ;;  %v1602_v8 = vld [vmem:[#allocation8 + $0xf0] sm:$0xff]   ;;  %v1606_v12 = vld [vmem:[#allocation8 + $0xe8] sm:$0xff]   ;;  %s1739_s14 = scalar_lea.vmem %s1157_s27, 64  ;;  %s1821_s16 = smov [#allocation10]  }
  0x7e   : > { %v1599_v4 = vld [vmem:[#allocation8 + $0x38] sm:$0xff]   ;;  %v1603_v9 = vld [vmem:[#allocation8 + $0x30] sm:$0xff]   ;;  %v1607_v13 = vld [vmem:[#allocation8 + $0x28] sm:$0xff]   ;;  %p1740_p4 = scmp.ne.s32.totalorder %s1157_s27, %s1739_s14  ;;  %s1743_s30 = sshll.u32 %s1821_s16, 4  ;;  %s1744_s30 = int_to_ptr.vmem [resolvable:$false] %s1743_s30 }
  0x7f   : > { %711 = vmatpush1.bf16.msra.mxu0 %v1539_v26  ;;  %752 = vmatpush1.bf16.msra.mxu1 %v1540_v27  ;;  %v1600_v6 = vld [vmem:[#allocation8 + $0xb8] sm:$0xff]   ;;  %v1604_v10 = vld [vmem:[#allocation8 + $0xb0] sm:$0xff]   ;;  %v1608_v14 = vld [vmem:[#allocation8 + $0xa8] sm:$0xff]   ;;  %s1745_s22 = scalar_lea.vmem %s1744_s30, 128  ;;  %p1746_p5 = scmp.lt.s32.totalorder %s1157_s27, %s1744_s30 }
  0x80   : > { %712 = vmatprep.subr.bf16.mxu0 %v1541_v28  ;;  %753 = vmatprep.subr.bf16.mxu1 %v1543_v29  ;;  %v1610_v16 = vld [vmem:[#allocation8 + $0xe0] sm:$0xff]   ;;  %v1613_v19 = vld [vmem:[#allocation8 + $0x58] sm:$0xff]   ;;  %v1617_v23 = vld [vmem:[#allocation8 + $0x50] sm:$0xff]   ;;  %p1741_p12 = pnand %p1740_p4, %p2059_p6  ;;  %p1747_p3 = scmp.lt.s32.totalorder %s1745_s22, %s1739_s14 }
  0x81   : > { %v1611_v17 = vld [vmem:[#allocation8 + $0x20] sm:$0xff]   ;;  %v1614_v20 = vld [vmem:[#allocation8 + $0xd8] sm:$0xff]   ;;  %v1618_v24 = vld [vmem:[#allocation8 + $0xd0] sm:$0xff]  }
  0x82   : > { %v1612_v18 = vld [vmem:[#allocation8 + $0xa0] sm:$0xff]   ;;  %v1615_v21 = vld [vmem:[#allocation8 + $0x18] sm:$0xff]   ;;  %v1619_v25 = vld [vmem:[#allocation8 + $0x10] sm:$0xff]   ;;  %p1742_p0 = pneg %p1741_p12  ;;  %p1748_p7 = por %p1747_p3, %p1746_p5 }
  0x83   : > { %713 = vmatpush1.bf16.msra.mxu0 %v1545_v30  ;;  %754 = vmatpush1.bf16.msra.mxu1 %v1546_v31  ;;  %v1616_v22 = vld [vmem:[#allocation8 + $0x98] sm:$0xff]   ;;  %v1620_v26 = vld [vmem:[#allocation8 + $0x90] sm:$0xff]   ;;  %v1621_v27 = vld [vmem:[#allocation8 + $0x48] sm:$0xff]  }
  0x84   : > { %714 = vmatprep.subr.bf16.mxu0 %v1547_v32  ;;  %755 = vmatprep.subr.bf16.mxu1 %v1549_v33  ;;  %v1622_v28 = vld [vmem:[#allocation8 + $0xc8] sm:$0xff]   ;;  %v1625_v31 = vld [vmem:[#allocation8 + $0x40] sm:$0xff]   ;;  %p1749_p9 = pnand %p1748_p7, %p1742_p0 }
  0x85   : > { %v1623_v29 = vld [vmem:[#allocation8 + $0x8] sm:$0xff]   ;;  %v1626_v32 = vld [vmem:[#allocation8 + $0xc0] sm:$0xff]  }
  0x86   : > { %v1624_v30 = vld [vmem:[#allocation8 + $0x88] sm:$0xff]   ;;  %v1627_v33 = vld [vmem:[#allocation8] sm:$0xff]  }
  0x87   : > { %715 = vmatpush2.bf16.msra.mxu0 %v1551_v34  ;;  %756 = vmatpush2.bf16.msra.mxu1 %v1552_v35  ;;  %v1628_v34 = vld [vmem:[#allocation8 + $0x80] sm:$0xff]   ;;  %v351_v35 = vlaneseq }
  0x88   : > { %716 = vmatprep.subr.bf16.mxu0 %v1553_v36  ;;  %757 = vmatprep.subr.bf16.mxu1 %v1555_v37 }
  0x89   : > { %v352_v36 = vshrl.u32 %v351_v35, 7 }
  0x8b   : > { %717 = vmatpush2.bf16.msra.mxu0 %v1557_v38  ;;  %758 = vmatpush2.bf16.msra.mxu1 %v1558_v39  ;;  %v353_v37 = vsub.s32 0, %v352_v36  ;;  %v361_v38 = vsub.s32 2, %v352_v36  ;;  %v349_v39 = vld [vmem:[#allocation7] sm:$0xf] }
  0x8c   : > { %718 = vmatprep.subr.bf16.mxu0 %v1559_v40  ;;  %759 = vmatprep.subr.bf16.mxu1 %v1561_v41  ;;  %v357_v40 = vsub.s32 1, %v352_v36  ;;  %v365_v41 = vsub.s32 3, %v352_v36 }
  0x8f   : > { %719 = vmatpush2.bf16.msra.mxu0 %v1563_v42  ;;  %760 = vmatpush2.bf16.msra.mxu1 %v1564_v43  ;;  %v354_v42 = vrot.slane %v349_v39, %v353_v37  ;;  %v362_v43 = vrot.slane %v349_v39, %v361_v38 }
  0x90   : > { %720 = vmatprep.subr.bf16.mxu0 %v1565_v44  ;;  %761 = vmatprep.subr.bf16.mxu1 %v1567_v45  ;;  %v358_v44 = vrot.slane %v349_v39, %v357_v40  ;;  %v366_v45 = vrot.slane %v349_v39, %v365_v41 }
  0x93   : > { %721 = vmatpush2.bf16.msra.mxu0 %v1569_v46  ;;  %762 = vmatpush2.bf16.msra.mxu1 %v1570_v48 }
  0x94   : > { %722 = vmatprep.subr.bf16.mxu0 %v1571_v50  ;;  %763 = vmatprep.subr.bf16.mxu1 %v1573_v51 }
  0x97   : > { %723 = vmatpush2.bf16.msra.mxu0 %v1575_v52  ;;  %764 = vmatpush2.bf16.msra.mxu1 %v1576_v53 }
  0x98   : > { %724 = vmatprep.subr.bf16.mxu0 %v1577_v54  ;;  %765 = vmatprep.subr.bf16.mxu1 %v1579_v55 }
  0x9b   : > { %725 = vmatpush2.bf16.msra.mxu0 %v1581_v56  ;;  %766 = vmatpush2.bf16.msra.mxu1 %v1582_v57 }
  0x9c   : > { %726 = vmatprep.subr.bf16.mxu0 %v1583_v58  ;;  %767 = vmatprep.subr.bf16.mxu1 %v1585_v59 }
  0x9f   : > { %727 = vmatpush2.bf16.msra.mxu0 %v1587_v60  ;;  %768 = vmatpush2.bf16.msra.mxu1 %v1588_v61 }
  0xa0   : > { %728 = vmatprep.subr.bf16.mxu0 %v1589_v62  ;;  %769 = vmatprep.subr.bf16.mxu1 %v1591_v63 }
  0xa3   : > { %729 = vmatpush2.bf16.msra.mxu0 %v1593_v0  ;;  %770 = vmatpush2.bf16.msra.mxu1 %v1594_v1 }
  0xa4   : > { %1374 = vmatprep.subr.bf16.mxu0 %v1597_v2  ;;  %1396 = vmatprep.subr.bf16.mxu1 %v1598_v3 }
  0xa6   : > { %731 = vmatmul.mubr.bf16.vlgmr.msra.gmra.mxu0 %v1270_v5  ;;  %772 = vmatmul.mubr.bf16.vlgmr.msra.gmra.mxu1 %v1270_v5 }
  0xa7   : > { %1375 = vmatpush3.bf16.msra.mxu0 %v1599_v4  ;;  %1397 = vmatpush3.bf16.msra.mxu1 %v1600_v6  ;;  %v1336_v4 = vld [vmem:[%s2040_s4] ss:$0 sm:$0xff] }
  0xa8   : > { %1376 = vmatprep.subr.bf16.mxu0 %v1601_v7  ;;  %1398 = vmatprep.subr.bf16.mxu1 %v1602_v8 }
  0xab   : > { %1377 = vmatpush3.bf16.msra.mxu0 %v1603_v9  ;;  %1399 = vmatpush3.bf16.msra.mxu1 %v1604_v10 }
  0xac   : > { %1378 = vmatprep.subr.bf16.mxu0 %v1605_v11  ;;  %1400 = vmatprep.subr.bf16.mxu1 %v1606_v12 }
  0xaf   : > { %1379 = vmatpush3.bf16.msra.mxu0 %v1607_v13  ;;  %1401 = vmatpush3.bf16.msra.mxu1 %v1608_v14 }
  0xb0   : > { %1380 = vmatprep.subr.bf16.mxu0 %v1609_v15  ;;  %1402 = vmatprep.subr.bf16.mxu1 %v1610_v16 }
  0xb3   : > { %1381 = vmatpush3.bf16.msra.mxu0 %v1611_v17  ;;  %1403 = vmatpush3.bf16.msra.mxu1 %v1612_v18 }
  0xb4   : > { %1382 = vmatprep.subr.bf16.mxu0 %v1613_v19  ;;  %1404 = vmatprep.subr.bf16.mxu1 %v1614_v20 }
  0xb7   : > { %1383 = vmatpush3.bf16.msra.mxu0 %v1615_v21  ;;  %1405 = vmatpush3.bf16.msra.mxu1 %v1616_v22 }
  0xb8   : > { %1384 = vmatprep.subr.bf16.mxu0 %v1617_v23  ;;  %1406 = vmatprep.subr.bf16.mxu1 %v1618_v24 }
  0xbb   : > { %1385 = vmatpush3.bf16.msra.mxu0 %v1619_v25  ;;  %1407 = vmatpush3.bf16.msra.mxu1 %v1620_v26 }
  0xbc   : > { %1386 = vmatprep.subr.bf16.mxu0 %v1621_v27  ;;  %1408 = vmatprep.subr.bf16.mxu1 %v1622_v28 }
  0xbf   : > { %1387 = vmatpush3.bf16.msra.mxu0 %v1623_v29  ;;  %1409 = vmatpush3.bf16.msra.mxu1 %v1624_v30 }
  0xc0   : > { %1388 = vmatprep.subr.bf16.mxu0 %v1625_v31  ;;  %1410 = vmatprep.subr.bf16.mxu1 %v1626_v32 }
  0xc3   : > { %1389 = vmatpush3.bf16.msra.mxu0 %v1627_v33  ;;  %1411 = vmatpush3.bf16.msra.mxu1 %v1628_v34 }
 0x166   : > { %v732_v46 = vpop.f32.mrf.mxu0  ;;  %v773_v47 = vpop.f32.mrf.mxu1 }
 0x167   : > { %v733_v48 = vadd.f32 %v732_v46, %v354_v42  ;;  %v774_v49 = vadd.f32 %v773_v47, %v362_v43 }
 0x168   : > { %v734_v50 = vpop.f32.mrf.mxu0  ;;  %v775_v51 = vpop.f32.mrf.mxu1 }
 0x169   : > { %v782_v52 = vmax.f32 %v774_v49, 0.0  ;;  %v735_v53 = vadd.f32 %v734_v50, %v358_v44  ;;  %v776_v54 = vadd.f32 %v775_v51, %v366_v45  ;;  %v780_v55 = vmax.f32 %v733_v48, 0.0 }
 0x16a   : > { %v736_v56 = vpop.f32.mrf.mxu0  ;;  %v777_v57 = vpop.f32.mrf.mxu1 }
 0x16b   : > { %v781_v58 = vmax.f32 %v735_v53, 0.0  ;;  %v783_v59 = vmax.f32 %v776_v54, 0.0  ;;  %v786_v60 = vpack.c.bf16 %v782_v52, %v782_v52  ;;  %v784_v1 = vpack.c.bf16 %v780_v55, %v780_v55 }
 0x16c   : > { %v737_v61 = vpop.f32.mrf.mxu0  ;;  %v778_v62 = vpop.f32.mrf.mxu1 }
 0x16d   : > { %v785_v63 = vpack.c.bf16 %v781_v58, %v781_v58  ;;  %v787_v0 = vpack.c.bf16 %v783_v59, %v783_v59 }
 0x16f   : > { %1083 = vmatprep.mubr.bf16.mxu0 %v785_v63  ;;  %1123 = vmatprep.mubr.bf16.mxu1 %v787_v0 }
 0x170   : > { %1084 = vmatmul.mubr.bf16.vlgmr.msra.gmra.mxu0 %v784_v1  ;;  %1124 = vmatmul.mubr.bf16.vlgmr.msra.gmra.mxu1 %v786_v60 }
 0x230   : > { %v1390_v2 = vpop.f32.mrf.mxu0  ;;  %v1412_v3 = vpop.f32.mrf.mxu1 }
 0x232   : > { %v1391_v5 = vpop.f32.mrf.mxu0  ;;  %v1413_v6 = vpop.f32.mrf.mxu1 }
 0x233   : > { %v1392_v7 = vadd.f32 %v1391_v5, %v1390_v2  ;;  %v1414_v11 = vadd.f32 %v1413_v6, %v1412_v3 }
 0x234   : > { %v1393_v8 = vpop.f32.mrf.mxu0  ;;  %v1415_v9 = vpop.f32.mrf.mxu1 }
 0x235   : > { %v1086_v10 = vadd.f32 %v1392_v7, %v1336_v4 }
 0x236   : > { %v1394_v12 = vpop.f32.mrf.mxu0  ;;  %v1416_v13 = vpop.f32.mrf.mxu1 }
 0x237   : > { %v1126_v14 = vadd.f32 %v1414_v11, %v1086_v10 }
 0x239   : > { %1131 = vmax.xlane.f32.xlu0 %v1126_v14 }
 0x2c2   : > { %v1132_v15 = vpop.xlane.xlu0 %1131 }
 0x2c3   : > { %v1133_v16 = vsub.f32 %v1126_v14, %v1132_v15 }
 0x2c5   : > { %v1134_v17 = vmul.f32 1.442695, %v1133_v16 }
 0x2c7   : > { %1629 = vpow2.f32 %v1134_v17 }
 0x2d4   : > { %v1630_v18 = vpop.eup %1629 }
 0x2d5   : > { %1136 = vadd.xlane.f32.xlu0 %v1630_v18 }
 0x35e   : > { %v1137_v19 = vpop.xlane.xlu0 %1136 }
 0x35f   : > { %1631 = vrcp.f32 %v1137_v19 }
 0x36c   : > { %v1632_v20 = vpop.eup %1631 }
 0x36d   : > { %v1139_v21 = vmul.f32 %v1632_v20, %v1630_v18 }
 0x36f   : > { %v1140_v22 = vpack.c.bf16 %v1139_v21, %v1139_v21 }
 0x371   : > { %1141 = vst [vmem:[%s282_s23] sm:$0xf] %v1140_v22 }
 0x372   : > { %1752 = shalt.err (!%p1749_p9)
}
 0x373   : > { %s1753_s7 = scalar_lea.hbm %s1154_s13, 64  ;;  %s1757_s24 = scalar_lea.hbm %s2041_s5, 128 }
 0x374   : > { %p1754_p13 = scmp.ne.s32.totalorder %s1154_s13, %s1753_s7  ;;  %p1758_p10 = scmp.lt.s32.totalorder %s1154_s13, %s2041_s5 }
 0x375   : > { %p1759_p11 = scmp.lt.s32.totalorder %s1757_s24, %s1753_s7 }
 0x376   : > { %p1755_p1 = pnand %p1754_p13, %p2059_p6 }
 0x377   : > { %p1760_p2 = por %p1759_p11, %p1758_p10 }
 0x378   : > { %p1756_p8 = pneg %p1755_p1 }
 0x37a   : > { %p1761_p4 = pnand %p1760_p2, %p1756_p8 }
 0x37c   : > { %1764 = shalt.err (!%p1761_p4)
}
 0x37d   : > { %1432 = dma.vmem_to_hbm [thread:$0]  (%p2059_p6), %s1157_s27, 64, %s1154_s13, %s1143_s29  }
 0x37e PF: > { %s1168_s17 = sand.u32 1, %s1799_s18   ;;  %p2060_p12 = scmp.ne.s32.totalorder %s2047_s25, 0 }
 0x37f   : > { %p2061_p0 = scmp.ge.s32.totalorder %s1811_s21, 2  ;;  %s1169_s23 = scalar_lea.sflag [#allocation4], %s1168_s17 }
 0x381   : > { %p1449_p5 = pnand %p2061_p0, %p2060_p12 }
 0x383   : > { %p1450_p3 = pneg %p1449_p5 }
 0x385   : > { %1794 = dma.done.wait (%p1450_p3), %s1169_s23, 64  }
 0x386   : > { %1796 = vsyncadd (%p1450_p3), %s1169_s23, 4294967232  ;;  %p20_p7 = scmp.ge.s32.totalorder %s1932_s6, 4   ;;  %s2062_s18 = smov %s1803_s19 }
 0x387   : > { %s2063_s19 = smov %s1807_s20  ;;  %s2064_s20 = smov %s1942_s10 }
 0x388   : > { %s2065_s21 = smov %s1932_s6  ;;  %22 = sbr.rel (!%p20_p7) target bundleno = 7 (0x7), region = 97 }
 0x38d   :  { %1174 = vsyncpa [#allocation3], 1 }
 0x38e   :  { %1176 = vsyncpa [#allocation3 + $0x1], 1 }
 0x38f   :  { %1177 = vsyncpa [#allocation6], 1 }
 0x390   :  { %1178 = vsyncpa [#allocation9], 1 }
 0x391   :  { %1179 = vsyncpa [#allocation4], 1 }
 0x392   :  { %1181 = vsyncpa [#allocation4 + $0x1], 1 }

// kernel: tpu_custom_call.1
= control target key start
LH: loop header
LB: loop body
LE: loop exit
PB: predicated region body
PF: predicated region fallthrough
CT: control target
= control target key end

     0   :  { %10 = vsyncpa [#allocation3], 0  ;;  %s2036_s0 = inlined_call_operand.hbm [shape: bf16[16,256], index: 0, kind: input, shape index: {}]   ;;  %s2037_s1 = inlined_call_operand.hbm [shape: bf16[256,512], index: 1, kind: input, shape index: {}]   ;;  %s2038_s2 = inlined_call_operand.hbm [shape: f32[1,512], index: 2, kind: input, shape index: {}]   ;;  %s2039_s3 = inlined_call_operand.hbm [shape: bf16[512,128], index: 3, kind: input, shape index: {}]   ;;  %s2040_s4 = inlined_call_operand.vmem [shape: f32[1,128], index: 4, kind: input, shape index: {}]   ;;  %s2041_s5 = inlined_call_operand.hbm [shape: bf16[16,128], index: 5, kind: output, shape index: {}]  }
   0x1   :  { %12 = vsyncpa [#allocation3 + $0x1], 0 }
   0x2   :  { %13 = vsyncpa [#allocation6], 0 }
   0x3   :  { %14 = vsyncpa [#allocation9], 0 }
   0x4   :  { %15 = vsyncpa [#allocation4], 0 }
   0x5   :  { %17 = vsyncpa [#allocation4 + $0x1], 0  ;;  %s1852_s18 = smov 0   ;;  %s1854_s19 = smov 0  }
   0x6   :  { %s1856_s20 = smov 0   ;;  %s1858_s21 = smov 0  }
   0x7 LB: > { %s1873_s22 = sadd.s32 4294967295, %s1811_s21   ;;  %s1255_s23 = sadd.s32 4294967294, %s1811_s21   ;;  %s1811_s21 = sphi %s1858_s21, %s2065_s21   ;;  %s1807_s20 = sphi %s1856_s20, %s2064_s20   ;;  %s1803_s19 = sphi %s1854_s19, %s2063_s19   ;;  %s1799_s18 = sphi %s1852_s18, %s2062_s18  }
   0x8   : > { %p43_p0 = scmp.ne.s32.totalorder %s1803_s19, %s1799_s18  ;;  %p2042_p1 = scmp.eq.s32.totalorder %s1873_s22, 0 }
   0x9   : > { %p157_p3 = scmp.eq.s32.totalorder %s1255_s23, 1  ;;  %p1256_p5 = scmp.ge.s32.totalorder %s1811_s21, 1 }
   0xa   : > { %p1882_p4 = por %p2042_p1, %p43_p0  ;;  %p164_p7 = scmp.lt.s32.totalorder %s1811_s21, 3 }
   0xb   : > { %p1887_p6 = por %p157_p3, %p43_p0  ;;  %s1813_s27 = smov [#allocation5]  }
   0xc   : > { %s2046_s24 = scalar_select %p1882_p4, 1, 0 }
   0xd   : > { %s2047_s25 = scalar_select %p1887_p6, 1, 0 }
   0xe   : > { %p1892_p8 = pnand %p1256_p5, %p164_p7  ;;  %s176_s28 = sshll.u32 %s1813_s27, 4  ;;  %s177_s28 = int_to_ptr.vmem [resolvable:$true] %s176_s28 }
   0xf   : > { %s1814_s30 = smov [#allocation7]   ;;  %s1815_s7 = smov [#allocation8]  }
  0x10   : > { %s2048_s26 = scalar_select %p1892_p8, 1, 0 }
  0x11   : > { %p1434_p9 = pneg %p1892_p8  ;;  %s190_s6 = sshll.u32 %s1814_s30, 4  ;;  %s191_s6 = int_to_ptr.vmem [resolvable:$true] %s190_s6 }
  0x12   : > { %s200_s8 = sshll.u32 %s1815_s7, 4  ;;  %s1644_s9 = scalar_lea.vmem %s177_s28, 8192  ;;  %s201_s8 = int_to_ptr.vmem [resolvable:$true] %s200_s8 }
  0x13   : > { %p1901_p11 = pnand %p1434_p9, %p2042_p1  ;;  %p1645_p13 = scmp.ne.s32.totalorder %s177_s28, %s1644_s9 }
  0x14   : > { %p1652_p5 = scmp.lt.s32.totalorder %s177_s28, %s177_s28  ;;  %p1653_p7 = scmp.lt.s32.totalorder %s1644_s9, %s1644_s9 }
  0x15   : > { %p1635_p12 = pneg %p1901_p11 }
  0x16   : > { %p1654_p9 = por %p1653_p7, %p1652_p5 }
  0x17   : > { %p1647_p0 = pnand %p1645_p13, %p1635_p12 }
  0x19   : > { %p1648_p3 = pneg %p1647_p0 }
  0x1b   : > { %p1655_p10 = pnand %p1654_p9, %p1648_p3 }
  0x1d   : > { %1658 = shalt.err (!%p1655_p10)
}
  0x1e   : > { %s1816_s10 = smov 256   ;;  %s1817_s11 = smov 16  }
  0x1f   : > { %1437 = dma.hbm_to_vmem [thread:$0]  (!%p1901_p11), %s2037_s1, 8192, %s177_s28, [#allocation6], %s1816_s10, %s1816_s10, %s1817_s11  }
  0x20   : > { %s1670_s14 = scalar_lea.vmem %s191_s6, 64  ;;  %p1678_p2 = scmp.lt.s32.totalorder %s191_s6, %s191_s6 }
  0x21   : > { %p1671_p1 = scmp.ne.s32.totalorder %s191_s6, %s1670_s14  ;;  %p1679_p6 = scmp.lt.s32.totalorder %s1670_s14, %s1670_s14 }
  0x23   : > { %p1673_p13 = pnand %p1671_p1, %p1635_p12  ;;  %p1680_p5 = por %p1679_p6, %p1678_p2 }
  0x25   : > { %p1674_p0 = pneg %p1673_p13 }
  0x27   : > { %p1681_p3 = pnand %p1680_p5, %p1674_p0 }
  0x29   : > { %1684 = shalt.err (!%p1681_p3)
}
  0x2a   : > { %1440 = dma.hbm_to_vmem [thread:$0]  (!%p1901_p11), %s2038_s2, 64, %s191_s6, [#allocation6]  }
  0x2b   : > { %s1696_s17 = scalar_lea.vmem %s201_s8, 4096  ;;  %p1704_p9 = scmp.lt.s32.totalorder %s201_s8, %s201_s8 }
  0x2c   : > { %p1697_p10 = scmp.ne.s32.totalorder %s201_s8, %s1696_s17  ;;  %p1705_p13 = scmp.lt.s32.totalorder %s1696_s17, %s1696_s17 }
  0x2e   : > { %p1699_p7 = pnand %p1697_p10, %p1635_p12  ;;  %p1706_p4 = por %p1705_p13, %p1704_p9 }
  0x30   : > { %p1700_p1 = pneg %p1699_p7 }
  0x32   : > { %p1707_p2 = pnand %p1706_p4, %p1700_p1 }
  0x34   : > { %1710 = shalt.err (!%p1707_p2)
}
  0x35   : > { %s1818_s23 = smov 64   ;;  %s1819_s27 = smov 4  }
  0x36   : > { %1443 = dma.hbm_to_vmem [thread:$0]  (!%p1901_p11), %s2039_s3, 4096, %s201_s8, [#allocation9], %s1818_s23, %s1818_s23, %s1819_s27  }
  0x37   : > { %s1932_s6 = sadd.s32 1, %s1811_s21   ;;  %s30_s9 = sadd.s32 1, %s1807_s20 }
  0x38   : > { %s27_s7 = ssub.s32 %s1811_s21, %s1932_s6  ;;  %p37_p6 = scmp.ne.s32.totalorder %s1807_s20, %s1803_s19 }
  0x39   : > { %p28_p4 = scmp.eq.s32.totalorder %s27_s7, 0  ;;  %p38_p12 = scmp.eq.s32.totalorder %s1811_s21, 0 }
  0x3a   : > { %p1455_p0 = scmp.lt.s32.totalorder %s1811_s21, 2  ;;  %p2050_p3 = scmp.eq.s32.totalorder %s1873_s22, 1 }
  0x3b   : > { %s1942_s10 = scalar_select %p28_p4, %s1807_s20, %s30_s9  }
  0x3c   : > { %p39_p5 = por %p38_p12, %p37_p6  ;;  %p1946_p10 = por %p2050_p3, %p37_p6 }
  0x3d   : > { %s217_s29 = sand.u32 1, %s1807_s20   ;;  %s1373_s12 = sshll.u32 %s1811_s21, 7 }
  0x3e   : > { %s2051_s11 = scalar_select %p1946_p10, 1, 0 }
  0x3f   : > { %s1261_s8 = sshll.u32 %s217_s29, 3  ;;  %s1955_s15 = scalar_lea.hbm %s2036_s0, %s1373_s12 }
  0x40   : > { %s221_s16 = scalar_lea.vmem [#allocation2], %s1261_s8  ;;  %p1957_p11 = pnand %p1455_p0, %p39_p5 }
  0x41   : > { %s229_s17 = sshll.u32 %s221_s16, 4  ;;  %s218_s27 = scalar_lea.sflag [#allocation3], %s217_s29  ;;  %s230_s17 = int_to_ptr.vmem [resolvable:$true] %s229_s17 }
  0x42   : > { %s1711_s28 = scalar_lea.hbm %s1955_s15, 128  ;;  %p1713_p1 = pneg %p1957_p11 }
  0x43   : > { %p1712_p7 = scmp.ne.s32.totalorder %s1955_s15, %s1711_s28  ;;  %s1716_s9 = scalar_lea.hbm %s2036_s0, 256 }
  0x44   : > { %p1717_p2 = scmp.lt.s32.totalorder %s1955_s15, %s2036_s0  ;;  %p1718_p4 = scmp.lt.s32.totalorder %s1716_s9, %s1711_s28 }
  0x45   : > { %p1714_p9 = pnand %p1713_p1, %p1712_p7 }
  0x46   : > { %p1719_p6 = por %p1718_p4, %p1717_p2 }
  0x47   : > { %p1715_p13 = pneg %p1714_p9 }
  0x49   : > { %p1720_p12 = pnand %p1719_p6, %p1715_p13 }
  0x4b   : > { %1723 = shalt.err (!%p1720_p12)
}
  0x4c   : > { %s1724_s13 = scalar_lea.vmem %s230_s17, 128  ;;  %s1820_s29 = smov [#allocation2]  }
  0x4d   : > { %p1725_p0 = scmp.ne.s32.totalorder %s230_s17, %s1724_s13  ;;  %s1729_s14 = sshll.u32 %s1820_s29, 4  ;;  %s1730_s14 = int_to_ptr.vmem [resolvable:$false] %s1729_s14 }
  0x4e   : > { %s1731_s16 = scalar_lea.vmem %s1730_s14, 256  ;;  %p1732_p7 = scmp.lt.s32.totalorder %s230_s17, %s1730_s14 }
  0x4f   : > { %p1727_p5 = pnand %p1725_p0, %p1713_p1  ;;  %p1733_p9 = scmp.lt.s32.totalorder %s1731_s16, %s1724_s13 }
  0x51   : > { %p1728_p3 = pneg %p1727_p5  ;;  %p1734_p10 = por %p1733_p9, %p1732_p7 }
  0x53   : > { %p1735_p8 = pnand %p1734_p10, %p1728_p3 }
  0x55   : > { %1738 = shalt.err (!%p1735_p8)
}
  0x56   : > { %1447 = dma.hbm_to_vmem [thread:$0]  (!%p1957_p11), %s1955_s15, 128, %s230_s17, %s218_s27  }
  0x57   : > { %p2053_p13 = scmp.ne.s32.totalorder %s2048_s26, 0 }
  0x58   : > { %s1978_s28 = sand.u32 (!%p2053_p13), 1, %s1803_s19   ;;  %p2054_p1 = scmp.ne.s32.totalorder (!%p2053_p13), %s2046_s24, 0 }
  0x59   : > { %238 = sbr.rel (%p2053_p13) target bundleno = 894 (0x37e), region = 40  ;;  %s1265_s30 = sshll.u32 (!%p2053_p13), %s1978_s28, 3 }
  0x5a   : > { %s241_s7 = scalar_lea.sflag (!%p2053_p13), [#allocation3], %s1978_s28  ;;  %s1982_s9 = scalar_lea.vmem (!%p2053_p13), [#allocation2], %s1265_s30 }
  0x5e   : > { %1782 = dma.done.wait (%p2054_p1), %s241_s7, 128  }
  0x5f   : > { %1784 = vsyncadd (%p2054_p1), %s241_s7, 4294967168  ;;  %p2055_p8 = scmp.eq.s32.totalorder %s1873_s22, 0 }
  0x61   : > { %1786 = dma.done.wait (%p2055_p8), [#allocation6], 8256   ;;  %p2056_p10 = pmov %p2055_p8 }
  0x62   : > { %p2057_p11 = pmov %p2055_p8 }
  0x63   : > { %1788 = vsyncadd (%p2056_p10), [#allocation6], 4294959040 }
  0x64   : > { %1790 = dma.done.wait (%p2057_p11), [#allocation9], 4096   ;;  %p2058_p2 = pmov %p2055_p8 }
  0x65   : > { %v1499_v0 = vld [vmem:[#allocation5 + $0xe4] ss:$16 sps:$4 sm:$0xff]   ;;  %v1501_v1 = vld [vmem:[#allocation5 + $0xec] ss:$16 sps:$4 sm:$0xff]   ;;  %v1503_v2 = vld [vmem:[#allocation5 + $0xe0] ss:$16 sps:$4 sm:$0xff]  }
  0x66   : > { %1792 = vsyncadd (%p2058_p2), [#allocation9], 4294963200  ;;  %698 = vmatprep.subr.bf16.mxu0 %v1499_v0  ;;  %v1504_v3 = vld [vmem:[#allocation5 + $0xe8] ss:$16 sps:$4 sm:$0xff]   ;;  %739 = vmatprep.subr.bf16.mxu1 %v1501_v1  ;;  %v1505_v4 = vld [vmem:[#allocation5 + $0xc4] ss:$16 sps:$4 sm:$0xff]  }
  0x67   : > { %699 = vmatpush1.bf16.msra.mxu0 %v1503_v2  ;;  %740 = vmatpush1.bf16.msra.mxu1 %v1504_v3  ;;  %v1507_v5 = vld [vmem:[#allocation5 + $0xcc] ss:$16 sps:$4 sm:$0xff]   ;;  %v1509_v6 = vld [vmem:[#allocation5 + $0xc0] ss:$16 sps:$4 sm:$0xff]   ;;  %v1510_v7 = vld [vmem:[#allocation5 + $0xc8] ss:$16 sps:$4 sm:$0xff]  }
  0x68   : > { %700 = vmatprep.subr.bf16.mxu0 %v1505_v4  ;;  %741 = vmatprep.subr.bf16.mxu1 %v1507_v5  ;;  %v1511_v8 = vld [vmem:[#allocation5 + $0xa4] ss:$16 sps:$4 sm:$0xff]   ;;  %v1513_v9 = vld [vmem:[#allocation5 + $0xac] ss:$16 sps:$4 sm:$0xff]   ;;  %v1515_v10 = vld [vmem:[#allocation5 + $0xa0] ss:$16 sps:$4 sm:$0xff]  }
  0x69   : > { %v1516_v11 = vld [vmem:[#allocation5 + $0xa8] ss:$16 sps:$4 sm:$0xff]   ;;  %v1517_v12 = vld [vmem:[#allocation5 + $0x84] ss:$16 sps:$4 sm:$0xff]   ;;  %v1519_v13 = vld [vmem:[#allocation5 + $0x8c] ss:$16 sps:$4 sm:$0xff]  }
  0x6a   : > { %v1521_v14 = vld [vmem:[#allocation5 + $0x80] ss:$16 sps:$4 sm:$0xff]   ;;  %v1522_v15 = vld [vmem:[#allocation5 + $0x88] ss:$16 sps:$4 sm:$0xff]   ;;  %v1523_v16 = vld [vmem:[#allocation5 + $0x64] ss:$16 sps:$4 sm:$0xff]  }
  0x6b   : > { %701 = vmatpush1.bf16.msra.mxu0 %v1509_v6  ;;  %742 = vmatpush1.bf16.msra.mxu1 %v1510_v7  ;;  %v1525_v17 = vld [vmem:[#allocation5 + $0x6c] ss:$16 sps:$4 sm:$0xff]   ;;  %v1527_v18 = vld [vmem:[#allocation5 + $0x60] ss:$16 sps:$4 sm:$0xff]   ;;  %v1528_v19 = vld [vmem:[#allocation5 + $0x68] ss:$16 sps:$4 sm:$0xff]  }
  0x6c   : > { %702 = vmatprep.subr.bf16.mxu0 %v1511_v8  ;;  %743 = vmatprep.subr.bf16.mxu1 %v1513_v9  ;;  %v1529_v20 = vld [vmem:[#allocation5 + $0x44] ss:$16 sps:$4 sm:$0xff]   ;;  %v1531_v21 = vld [vmem:[#allocation5 + $0x4c] ss:$16 sps:$4 sm:$0xff]   ;;  %v1533_v22 = vld [vmem:[#allocation5 + $0x40] ss:$16 sps:$4 sm:$0xff]  }
  0x6d   : > { %v1534_v23 = vld [vmem:[#allocation5 + $0x48] ss:$16 sps:$4 sm:$0xff]   ;;  %v1535_v24 = vld [vmem:[#allocation5 + $0x24] ss:$16 sps:$4 sm:$0xff]   ;;  %v1537_v25 = vld [vmem:[#allocation5 + $0x2c] ss:$16 sps:$4 sm:$0xff]  }
  0x6e   : > { %v1539_v26 = vld [vmem:[#allocation5 + $0x20] ss:$16 sps:$4 sm:$0xff]   ;;  %v1540_v27 = vld [vmem:[#allocation5 + $0x28] ss:$16 sps:$4 sm:$0xff]   ;;  %v1541_v28 = vld [vmem:[#allocation5 + $0x4] ss:$16 sps:$4 sm:$0xff]  }
  0x6f   : > { %703 = vmatpush1.bf16.msra.mxu0 %v1515_v10  ;;  %744 = vmatpush1.bf16.msra.mxu1 %v1516_v11  ;;  %v1543_v29 = vld [vmem:[#allocation5 + $0xc] ss:$16 sps:$4 sm:$0xff]   ;;  %v1545_v30 = vld [vmem:[#allocation5] ss:$16 sps:$4 sm:$0xff]   ;;  %v1546_v31 = vld [vmem:[#allocation5 + $0x8] ss:$16 sps:$4 sm:$0xff]  }
  0x70   : > { %704 = vmatprep.subr.bf16.mxu0 %v1517_v12  ;;  %745 = vmatprep.subr.bf16.mxu1 %v1519_v13  ;;  %v1547_v32 = vld [vmem:[#allocation5 + $0x1e4] ss:$16 sps:$4 sm:$0xff]   ;;  %v1549_v33 = vld [vmem:[#allocation5 + $0x1ec] ss:$16 sps:$4 sm:$0xff]   ;;  %v1551_v34 = vld [vmem:[#allocation5 + $0x1e0] ss:$16 sps:$4 sm:$0xff]  }
  0x71   : > { %v1552_v35 = vld [vmem:[#allocation5 + $0x1e8] ss:$16 sps:$4 sm:$0xff]   ;;  %v1553_v36 = vld [vmem:[#allocation5 + $0x1c4] ss:$16 sps:$4 sm:$0xff]   ;;  %v1555_v37 = vld [vmem:[#allocation5 + $0x1cc] ss:$16 sps:$4 sm:$0xff]  }
  0x72   : > { %v1557_v38 = vld [vmem:[#allocation5 + $0x1c0] ss:$16 sps:$4 sm:$0xff]   ;;  %v1558_v39 = vld [vmem:[#allocation5 + $0x1c8] ss:$16 sps:$4 sm:$0xff]   ;;  %v1559_v40 = vld [vmem:[#allocation5 + $0x1a4] ss:$16 sps:$4 sm:$0xff]  }
  0x73   : > { %705 = vmatpush1.bf16.msra.mxu0 %v1521_v14  ;;  %746 = vmatpush1.bf16.msra.mxu1 %v1522_v15  ;;  %v1561_v41 = vld [vmem:[#allocation5 + $0x1ac] ss:$16 sps:$4 sm:$0xff]   ;;  %v1563_v42 = vld [vmem:[#allocation5 + $0x1a0] ss:$16 sps:$4 sm:$0xff]   ;;  %v1564_v43 = vld [vmem:[#allocation5 + $0x1a8] ss:$16 sps:$4 sm:$0xff]  }
  0x74   : > { %706 = vmatprep.subr.bf16.mxu0 %v1523_v16  ;;  %747 = vmatprep.subr.bf16.mxu1 %v1525_v17  ;;  %v1565_v44 = vld [vmem:[#allocation5 + $0x184] ss:$16 sps:$4 sm:$0xff]   ;;  %v1567_v45 = vld [vmem:[#allocation5 + $0x18c] ss:$16 sps:$4 sm:$0xff]   ;;  %v1569_v46 = vld [vmem:[#allocation5 + $0x180] ss:$16 sps:$4 sm:$0xff]  }
  0x75   : > { %v284_v47 = vld [vmem:[%s1982_s9] sm:$0xff]  ;;  %v1609_v15 = vld [vmem:[#allocation8 + $0x60] sm:$0xff]   ;;  %s1269_s15 = sshll.u32 %s1978_s28, 2  ;;  %s1370_s17 = sshll.u32 %s1873_s22, 6 }
  0x76   : > { %v1570_v48 = vld [vmem:[#allocation5 + $0x188] ss:$16 sps:$4 sm:$0xff]   ;;  %v1271_v49 = vcombine.high %v284_v47, %v284_v47  ;;  %v1571_v50 = vld [vmem:[#allocation5 + $0x164] ss:$16 sps:$4 sm:$0xff]   ;;  %v1573_v51 = vld [vmem:[#allocation5 + $0x16c] ss:$16 sps:$4 sm:$0xff]   ;;  %v1270_v5 = vcombine.low %v284_v47, %v284_v47  ;;  %s1154_s13 = scalar_lea.hbm %s2041_s5, %s1370_s17 }
  0x77   : > { %707 = vmatpush1.bf16.msra.mxu0 %v1527_v18  ;;  %748 = vmatpush1.bf16.msra.mxu1 %v1528_v19  ;;  %v1575_v52 = vld [vmem:[#allocation5 + $0x160] ss:$16 sps:$4 sm:$0xff]   ;;  %v1576_v53 = vld [vmem:[#allocation5 + $0x168] ss:$16 sps:$4 sm:$0xff]   ;;  %v1577_v54 = vld [vmem:[#allocation5 + $0x144] ss:$16 sps:$4 sm:$0xff]  }
  0x78   : > { %708 = vmatprep.subr.bf16.mxu0 %v1529_v20  ;;  %749 = vmatprep.subr.bf16.mxu1 %v1531_v21  ;;  %v1579_v55 = vld [vmem:[#allocation5 + $0x14c] ss:$16 sps:$4 sm:$0xff]   ;;  %v1581_v56 = vld [vmem:[#allocation5 + $0x140] ss:$16 sps:$4 sm:$0xff]   ;;  %v1582_v57 = vld [vmem:[#allocation5 + $0x148] ss:$16 sps:$4 sm:$0xff]  }
  0x79   : > { %730 = vmatprep.mubr.bf16.mxu0 %v1271_v49  ;;  %771 = vmatprep.mubr.bf16.mxu1 %v1271_v49  ;;  %v1583_v58 = vld [vmem:[#allocation5 + $0x124] ss:$16 sps:$4 sm:$0xff]   ;;  %v1585_v59 = vld [vmem:[#allocation5 + $0x12c] ss:$16 sps:$4 sm:$0xff]   ;;  %v1587_v60 = vld [vmem:[#allocation5 + $0x120] ss:$16 sps:$4 sm:$0xff]  }
  0x7a   : > { %v1588_v61 = vld [vmem:[#allocation5 + $0x128] ss:$16 sps:$4 sm:$0xff]   ;;  %v1589_v62 = vld [vmem:[#allocation5 + $0x104] ss:$16 sps:$4 sm:$0xff]   ;;  %v1591_v63 = vld [vmem:[#allocation5 + $0x10c] ss:$16 sps:$4 sm:$0xff]  }
  0x7b   : > { %709 = vmatpush1.bf16.msra.mxu0 %v1533_v22  ;;  %750 = vmatpush1.bf16.msra.mxu1 %v1534_v23  ;;  %v1593_v0 = vld [vmem:[#allocation5 + $0x100] ss:$16 sps:$4 sm:$0xff]   ;;  %v1594_v1 = vld [vmem:[#allocation5 + $0x108] ss:$16 sps:$4 sm:$0xff]   ;;  %s282_s23 = scalar_lea.vmem [#allocation10], %s1269_s15  ;;  %s1143_s29 = scalar_lea.sflag [#allocation4], %s1978_s28 }
  0x7c   : > { %710 = vmatprep.subr.bf16.mxu0 %v1535_v24  ;;  %751 = vmatprep.subr.bf16.mxu1 %v1537_v25  ;;  %v1597_v2 = vld [vmem:[#allocation8 + $0x78] sm:$0xff]   ;;  %v1601_v7 = vld [vmem:[#allocation8 + $0x70] sm:$0xff]   ;;  %v1605_v11 = vld [vmem:[#allocation8 + $0x68] sm:$0xff]   ;;  %s1156_s27 = sshll.u32 %s282_s23, 4  ;;  %p2059_p6 = scmp.ne.s32.totalorder %s2051_s11, 0  ;;  %s1157_s27 = int_to_ptr.vmem [resolvable:$true] %s1156_s27 }
  0x7d   : > { %v1598_v3 = vld [vmem:[#allocation8 + $0xf8] sm:$0xff]   ;;  %v1602_v8 = vld [vmem:[#allocation8 + $0xf0] sm:$0xff]   ;;  %v1606_v12 = vld [vmem:[#allocation8 + $0xe8] sm:$0xff]   ;;  %s1739_s14 = scalar_lea.vmem %s1157_s27, 64  ;;  %s1821_s16 = smov [#allocation10]  }
  0x7e   : > { %v1599_v4 = vld [vmem:[#allocation8 + $0x38] sm:$0xff]   ;;  %v1603_v9 = vld [vmem:[#allocation8 + $0x30] sm:$0xff]   ;;  %v1607_v13 = vld [vmem:[#allocation8 + $0x28] sm:$0xff]   ;;  %p1740_p4 = scmp.ne.s32.totalorder %s1157_s27, %s1739_s14  ;;  %s1743_s30 = sshll.u32 %s1821_s16, 4  ;;  %s1744_s30 = int_to_ptr.vmem [resolvable:$false] %s1743_s30 }
  0x7f   : > { %711 = vmatpush1.bf16.msra.mxu0 %v1539_v26  ;;  %752 = vmatpush1.bf16.msra.mxu1 %v1540_v27  ;;  %v1600_v6 = vld [vmem:[#allocation8 + $0xb8] sm:$0xff]   ;;  %v1604_v10 = vld [vmem:[#allocation8 + $0xb0] sm:$0xff]   ;;  %v1608_v14 = vld [vmem:[#allocation8 + $0xa8] sm:$0xff]   ;;  %s1745_s22 = scalar_lea.vmem %s1744_s30, 128  ;;  %p1746_p5 = scmp.lt.s32.totalorder %s1157_s27, %s1744_s30 }
  0x80   : > { %712 = vmatprep.subr.bf16.mxu0 %v1541_v28  ;;  %753 = vmatprep.subr.bf16.mxu1 %v1543_v29  ;;  %v1610_v16 = vld [vmem:[#allocation8 + $0xe0] sm:$0xff]   ;;  %v1613_v19 = vld [vmem:[#allocation8 + $0x58] sm:$0xff]   ;;  %v1617_v23 = vld [vmem:[#allocation8 + $0x50] sm:$0xff]   ;;  %p1741_p12 = pnand %p1740_p4, %p2059_p6  ;;  %p1747_p3 = scmp.lt.s32.totalorder %s1745_s22, %s1739_s14 }
  0x81   : > { %v1611_v17 = vld [vmem:[#allocation8 + $0x20] sm:$0xff]   ;;  %v1614_v20 = vld [vmem:[#allocation8 + $0xd8] sm:$0xff]   ;;  %v1618_v24 = vld [vmem:[#allocation8 + $0xd0] sm:$0xff]  }
  0x82   : > { %v1612_v18 = vld [vmem:[#allocation8 + $0xa0] sm:$0xff]   ;;  %v1615_v21 = vld [vmem:[#allocation8 + $0x18] sm:$0xff]   ;;  %v1619_v25 = vld [vmem:[#allocation8 + $0x10] sm:$0xff]   ;;  %p1742_p0 = pneg %p1741_p12  ;;  %p1748_p7 = por %p1747_p3, %p1746_p5 }
  0x83   : > { %713 = vmatpush1.bf16.msra.mxu0 %v1545_v30  ;;  %754 = vmatpush1.bf16.msra.mxu1 %v1546_v31  ;;  %v1616_v22 = vld [vmem:[#allocation8 + $0x98] sm:$0xff]   ;;  %v1620_v26 = vld [vmem:[#allocation8 + $0x90] sm:$0xff]   ;;  %v1621_v27 = vld [vmem:[#allocation8 + $0x48] sm:$0xff]  }
  0x84   : > { %714 = vmatprep.subr.bf16.mxu0 %v1547_v32  ;;  %755 = vmatprep.subr.bf16.mxu1 %v1549_v33  ;;  %v1622_v28 = vld [vmem:[#allocation8 + $0xc8] sm:$0xff]   ;;  %v1625_v31 = vld [vmem:[#allocation8 + $0x40] sm:$0xff]   ;;  %p1749_p9 = pnand %p1748_p7, %p1742_p0 }
  0x85   : > { %v1623_v29 = vld [vmem:[#allocation8 + $0x8] sm:$0xff]   ;;  %v1626_v32 = vld [vmem:[#allocation8 + $0xc0] sm:$0xff]  }
  0x86   : > { %v1624_v30 = vld [vmem:[#allocation8 + $0x88] sm:$0xff]   ;;  %v1627_v33 = vld [vmem:[#allocation8] sm:$0xff]  }
  0x87   : > { %715 = vmatpush2.bf16.msra.mxu0 %v1551_v34  ;;  %756 = vmatpush2.bf16.msra.mxu1 %v1552_v35  ;;  %v1628_v34 = vld [vmem:[#allocation8 + $0x80] sm:$0xff]   ;;  %v351_v35 = vlaneseq }
  0x88   : > { %716 = vmatprep.subr.bf16.mxu0 %v1553_v36  ;;  %757 = vmatprep.subr.bf16.mxu1 %v1555_v37 }
  0x89   : > { %v352_v36 = vshrl.u32 %v351_v35, 7 }
  0x8b   : > { %717 = vmatpush2.bf16.msra.mxu0 %v1557_v38  ;;  %758 = vmatpush2.bf16.msra.mxu1 %v1558_v39  ;;  %v353_v37 = vsub.s32 0, %v352_v36  ;;  %v361_v38 = vsub.s32 2, %v352_v36  ;;  %v349_v39 = vld [vmem:[#allocation7] sm:$0xf] }
  0x8c   : > { %718 = vmatprep.subr.bf16.mxu0 %v1559_v40  ;;  %759 = vmatprep.subr.bf16.mxu1 %v1561_v41  ;;  %v357_v40 = vsub.s32 1, %v352_v36  ;;  %v365_v41 = vsub.s32 3, %v352_v36 }
  0x8f   : > { %719 = vmatpush2.bf16.msra.mxu0 %v1563_v42  ;;  %760 = vmatpush2.bf16.msra.mxu1 %v1564_v43  ;;  %v354_v42 = vrot.slane %v349_v39, %v353_v37  ;;  %v362_v43 = vrot.slane %v349_v39, %v361_v38 }
  0x90   : > { %720 = vmatprep.subr.bf16.mxu0 %v1565_v44  ;;  %761 = vmatprep.subr.bf16.mxu1 %v1567_v45  ;;  %v358_v44 = vrot.slane %v349_v39, %v357_v40  ;;  %v366_v45 = vrot.slane %v349_v39, %v365_v41 }
  0x93   : > { %721 = vmatpush2.bf16.msra.mxu0 %v1569_v46  ;;  %762 = vmatpush2.bf16.msra.mxu1 %v1570_v48 }
  0x94   : > { %722 = vmatprep.subr.bf16.mxu0 %v1571_v50  ;;  %763 = vmatprep.subr.bf16.mxu1 %v1573_v51 }
  0x97   : > { %723 = vmatpush2.bf16.msra.mxu0 %v1575_v52  ;;  %764 = vmatpush2.bf16.msra.mxu1 %v1576_v53 }
  0x98   : > { %724 = vmatprep.subr.bf16.mxu0 %v1577_v54  ;;  %765 = vmatprep.subr.bf16.mxu1 %v1579_v55 }
  0x9b   : > { %725 = vmatpush2.bf16.msra.mxu0 %v1581_v56  ;;  %766 = vmatpush2.bf16.msra.mxu1 %v1582_v57 }
  0x9c   : > { %726 = vmatprep.subr.bf16.mxu0 %v1583_v58  ;;  %767 = vmatprep.subr.bf16.mxu1 %v1585_v59 }
  0x9f   : > { %727 = vmatpush2.bf16.msra.mxu0 %v1587_v60  ;;  %768 = vmatpush2.bf16.msra.mxu1 %v1588_v61 }
  0xa0   : > { %728 = vmatprep.subr.bf16.mxu0 %v1589_v62  ;;  %769 = vmatprep.subr.bf16.mxu1 %v1591_v63 }
  0xa3   : > { %729 = vmatpush2.bf16.msra.mxu0 %v1593_v0  ;;  %770 = vmatpush2.bf16.msra.mxu1 %v1594_v1 }
  0xa4   : > { %1374 = vmatprep.subr.bf16.mxu0 %v1597_v2  ;;  %1396 = vmatprep.subr.bf16.mxu1 %v1598_v3 }
  0xa6   : > { %731 = vmatmul.mubr.bf16.vlgmr.msra.gmra.mxu0 %v1270_v5  ;;  %772 = vmatmul.mubr.bf16.vlgmr.msra.gmra.mxu1 %v1270_v5 }
  0xa7   : > { %1375 = vmatpush3.bf16.msra.mxu0 %v1599_v4  ;;  %1397 = vmatpush3.bf16.msra.mxu1 %v1600_v6  ;;  %v1336_v4 = vld [vmem:[%s2040_s4] ss:$0 sm:$0xff] }
  0xa8   : > { %1376 = vmatprep.subr.bf16.mxu0 %v1601_v7  ;;  %1398 = vmatprep.subr.bf16.mxu1 %v1602_v8 }
  0xab   : > { %1377 = vmatpush3.bf16.msra.mxu0 %v1603_v9  ;;  %1399 = vmatpush3.bf16.msra.mxu1 %v1604_v10 }
  0xac   : > { %1378 = vmatprep.subr.bf16.mxu0 %v1605_v11  ;;  %1400 = vmatprep.subr.bf16.mxu1 %v1606_v12 }
  0xaf   : > { %1379 = vmatpush3.bf16.msra.mxu0 %v1607_v13  ;;  %1401 = vmatpush3.bf16.msra.mxu1 %v1608_v14 }
  0xb0   : > { %1380 = vmatprep.subr.bf16.mxu0 %v1609_v15  ;;  %1402 = vmatprep.subr.bf16.mxu1 %v1610_v16 }
  0xb3   : > { %1381 = vmatpush3.bf16.msra.mxu0 %v1611_v17  ;;  %1403 = vmatpush3.bf16.msra.mxu1 %v1612_v18 }
  0xb4   : > { %1382 = vmatprep.subr.bf16.mxu0 %v1613_v19  ;;  %1404 = vmatprep.subr.bf16.mxu1 %v1614_v20 }
  0xb7   : > { %1383 = vmatpush3.bf16.msra.mxu0 %v1615_v21  ;;  %1405 = vmatpush3.bf16.msra.mxu1 %v1616_v22 }
  0xb8   : > { %1384 = vmatprep.subr.bf16.mxu0 %v1617_v23  ;;  %1406 = vmatprep.subr.bf16.mxu1 %v1618_v24 }
  0xbb   : > { %1385 = vmatpush3.bf16.msra.mxu0 %v1619_v25  ;;  %1407 = vmatpush3.bf16.msra.mxu1 %v1620_v26 }
  0xbc   : > { %1386 = vmatprep.subr.bf16.mxu0 %v1621_v27  ;;  %1408 = vmatprep.subr.bf16.mxu1 %v1622_v28 }
  0xbf   : > { %1387 = vmatpush3.bf16.msra.mxu0 %v1623_v29  ;;  %1409 = vmatpush3.bf16.msra.mxu1 %v1624_v30 }
  0xc0   : > { %1388 = vmatprep.subr.bf16.mxu0 %v1625_v31  ;;  %1410 = vmatprep.subr.bf16.mxu1 %v1626_v32 }
  0xc3   : > { %1389 = vmatpush3.bf16.msra.mxu0 %v1627_v33  ;;  %1411 = vmatpush3.bf16.msra.mxu1 %v1628_v34 }
 0x166   : > { %v732_v46 = vpop.f32.mrf.mxu0  ;;  %v773_v47 = vpop.f32.mrf.mxu1 }
 0x167   : > { %v733_v48 = vadd.f32 %v732_v46, %v354_v42  ;;  %v774_v49 = vadd.f32 %v773_v47, %v362_v43 }
 0x168   : > { %v734_v50 = vpop.f32.mrf.mxu0  ;;  %v775_v51 = vpop.f32.mrf.mxu1 }
 0x169   : > { %v782_v52 = vmax.f32 %v774_v49, 0.0  ;;  %v735_v53 = vadd.f32 %v734_v50, %v358_v44  ;;  %v776_v54 = vadd.f32 %v775_v51, %v366_v45  ;;  %v780_v55 = vmax.f32 %v733_v48, 0.0 }
 0x16a   : > { %v736_v56 = vpop.f32.mrf.mxu0  ;;  %v777_v57 = vpop.f32.mrf.mxu1 }
 0x16b   : > { %v781_v58 = vmax.f32 %v735_v53, 0.0  ;;  %v783_v59 = vmax.f32 %v776_v54, 0.0  ;;  %v786_v60 = vpack.c.bf16 %v782_v52, %v782_v52  ;;  %v784_v1 = vpack.c.bf16 %v780_v55, %v780_v55 }
 0x16c   : > { %v737_v61 = vpop.f32.mrf.mxu0  ;;  %v778_v62 = vpop.f32.mrf.mxu1 }
 0x16d   : > { %v785_v63 = vpack.c.bf16 %v781_v58, %v781_v58  ;;  %v787_v0 = vpack.c.bf16 %v783_v59, %v783_v59 }
 0x16f   : > { %1083 = vmatprep.mubr.bf16.mxu0 %v785_v63  ;;  %1123 = vmatprep.mubr.bf16.mxu1 %v787_v0 }
 0x170   : > { %1084 = vmatmul.mubr.bf16.vlgmr.msra.gmra.mxu0 %v784_v1  ;;  %1124 = vmatmul.mubr.bf16.vlgmr.msra.gmra.mxu1 %v786_v60 }
 0x230   : > { %v1390_v2 = vpop.f32.mrf.mxu0  ;;  %v1412_v3 = vpop.f32.mrf.mxu1 }
 0x232   : > { %v1391_v5 = vpop.f32.mrf.mxu0  ;;  %v1413_v6 = vpop.f32.mrf.mxu1 }
 0x233   : > { %v1392_v7 = vadd.f32 %v1391_v5, %v1390_v2  ;;  %v1414_v11 = vadd.f32 %v1413_v6, %v1412_v3 }
 0x234   : > { %v1393_v8 = vpop.f32.mrf.mxu0  ;;  %v1415_v9 = vpop.f32.mrf.mxu1 }
 0x235   : > { %v1086_v10 = vadd.f32 %v1392_v7, %v1336_v4 }
 0x236   : > { %v1394_v12 = vpop.f32.mrf.mxu0  ;;  %v1416_v13 = vpop.f32.mrf.mxu1 }
 0x237   : > { %v1126_v14 = vadd.f32 %v1414_v11, %v1086_v10 }
 0x239   : > { %1131 = vmax.xlane.f32.xlu0 %v1126_v14 }
 0x2c2   : > { %v1132_v15 = vpop.xlane.xlu0 %1131 }
 0x2c3   : > { %v1133_v16 = vsub.f32 %v1126_v14, %v1132_v15 }
 0x2c5   : > { %v1134_v17 = vmul.f32 1.442695, %v1133_v16 }
 0x2c7   : > { %1629 = vpow2.f32 %v1134_v17 }
 0x2d4   : > { %v1630_v18 = vpop.eup %1629 }
 0x2d5   : > { %1136 = vadd.xlane.f32.xlu0 %v1630_v18 }
 0x35e   : > { %v1137_v19 = vpop.xlane.xlu0 %1136 }
 0x35f   : > { %1631 = vrcp.f32 %v1137_v19 }
 0x36c   : > { %v1632_v20 = vpop.eup %1631 }
 0x36d   : > { %v1139_v21 = vmul.f32 %v1632_v20, %v1630_v18 }
 0x36f   : > { %v1140_v22 = vpack.c.bf16 %v1139_v21, %v1139_v21 }
 0x371   : > { %1141 = vst [vmem:[%s282_s23] sm:$0xf] %v1140_v22 }
 0x372   : > { %1752 = shalt.err (!%p1749_p9)
}
 0x373   : > { %s1753_s7 = scalar_lea.hbm %s1154_s13, 64  ;;  %s1757_s24 = scalar_lea.hbm %s2041_s5, 128 }
 0x374   : > { %p1754_p13 = scmp.ne.s32.totalorder %s1154_s13, %s1753_s7  ;;  %p1758_p10 = scmp.lt.s32.totalorder %s1154_s13, %s2041_s5 }
 0x375   : > { %p1759_p11 = scmp.lt.s32.totalorder %s1757_s24, %s1753_s7 }
 0x376   : > { %p1755_p1 = pnand %p1754_p13, %p2059_p6 }
 0x377   : > { %p1760_p2 = por %p1759_p11, %p1758_p10 }
 0x378   : > { %p1756_p8 = pneg %p1755_p1 }
 0x37a   : > { %p1761_p4 = pnand %p1760_p2, %p1756_p8 }
 0x37c   : > { %1764 = shalt.err (!%p1761_p4)
}
 0x37d   : > { %1432 = dma.vmem_to_hbm [thread:$0]  (%p2059_p6), %s1157_s27, 64, %s1154_s13, %s1143_s29  }
 0x37e PF: > { %s1168_s17 = sand.u32 1, %s1799_s18   ;;  %p2060_p12 = scmp.ne.s32.totalorder %s2047_s25, 0 }
 0x37f   : > { %p2061_p0 = scmp.ge.s32.totalorder %s1811_s21, 2  ;;  %s1169_s23 = scalar_lea.sflag [#allocation4], %s1168_s17 }
 0x381   : > { %p1449_p5 = pnand %p2061_p0, %p2060_p12 }
 0x383   : > { %p1450_p3 = pneg %p1449_p5 }
 0x385   : > { %1794 = dma.done.wait (%p1450_p3), %s1169_s23, 64  }
 0x386   : > { %1796 = vsyncadd (%p1450_p3), %s1169_s23, 4294967232  ;;  %p20_p7 = scmp.ge.s32.totalorder %s1932_s6, 4   ;;  %s2062_s18 = smov %s1803_s19 }
 0x387   : > { %s2063_s19 = smov %s1807_s20  ;;  %s2064_s20 = smov %s1942_s10 }
 0x388   : > { %s2065_s21 = smov %s1932_s6  ;;  %22 = sbr.rel (!%p20_p7) target bundleno = 7 (0x7), region = 97 }
 0x38d   :  { %1174 = vsyncpa [#allocation3], 1 }
 0x38e   :  { %1176 = vsyncpa [#allocation3 + $0x1], 1 }
 0x38f   :  { %1177 = vsyncpa [#allocation6], 1 }
 0x390   :  { %1178 = vsyncpa [#allocation9], 1 }
 0x391   :  { %1179 = vsyncpa [#allocation4], 1 }
 0x392   :  { %1181 = vsyncpa [#allocation4 + $0x1], 1 }

</bundles_post_ra>
